<compile_context>
chip_gen: v6e
topology: v6e:2x2x1
jax: 0.10.0
libtpu: 0.0.40
codegen_flags: <defaults>
</compile_context>

<pallas_src>
import functools

import jax
import jax.numpy as jnp
from jax.experimental import pallas as pl
from jax.experimental.pallas import tpu as pltpu


# ----------------------------------------------------------------------------
# Hardware queries (best-effort, with safe fallbacks)
# ----------------------------------------------------------------------------
def _num_tensorcores():
    try:
        info = pltpu.get_tpu_info()
        for name in ("num_cores", "core_count", "num_tensorcores",
                     "tensorcores_per_chip", "cores_per_chip"):
            v = getattr(info, name, None)
            if isinstance(v, int) and 1 <= v <= 16:
                return int(v)
    except Exception:
        pass
    try:
        v = getattr(jax.devices()[0], "num_cores", None)
        if isinstance(v, int) and 1 <= v <= 16:
            return int(v)
    except Exception:
        pass
    return 1  # v5e / v6e: one TensorCore per chip


def _vmem_budget_bytes():
    try:
        cap = getattr(pltpu.get_tpu_info(), "vmem_capacity_bytes", None)
        if isinstance(cap, int) and cap > 0:
            return min(cap // 3, 40 << 20)   # v7x: ~21 MiB, v5e/v6e: 40 MiB
    except Exception:
        pass
    return 20 << 20


def _pick_b_tile(B, per_b_bytes, fixed_bytes, n_cores, vmem_budget):
    avail = max(vmem_budget - fixed_bytes, per_b_bytes)
    t_mem = max(1, min(B, avail // per_b_bytes))
    # Enough steps to feed every TensorCore (v7x: 2, v5e/v6e: 1); once B is
    # large, >=4 steps/core so the double-buffered pipeline hides the x/out
    # slab DMA (weights have constant index_maps and are fetched once).
    target_steps = n_cores if B < 4 * n_cores else 4 * n_cores
    t_steps = max(1, (B + target_steps - 1) // target_steps)
    return int(max(1, min(t_mem, t_steps)))


# ----------------------------------------------------------------------------
# Fused kernel: per grid step, a (b_tile, N, patch_len*d_model) slab of the
# original input is turned directly into the final (b_tile, N, patch_len*d_model)
# output.  Only leading-dim reshapes, static lane slices and MXU dots inside.
# ----------------------------------------------------------------------------
def _season_attn_kernel(x_ref, w_qkv_ref, b_qkv_ref, w_comb_ref, b_comb_ref,
                        o_ref, *, d_feature, d_ff, d_model):
    T, N, PD = x_ref.shape
    cd = w_qkv_ref.dtype                      # MXU operand dtype (bf16 or f32)

    # Fused input-linear + q/k/v projections: one big lane-dense matmul.
    x2 = x_ref[...].reshape(T * N, PD).astype(cd)
    qkv = jnp.dot(x2, w_qkv_ref[...], preferred_element_type=jnp.float32)
    qkv = (qkv + b_qkv_ref[...]).reshape(T, N, qkv.shape[-1])   # f32

    k_off = d_feature * d_ff
    v_off = 2 * d_feature * d_ff

    # Per-feature attention.  The 32-lane slices below are intra-tile (not
    # 128-aligned) but operate on a handful of vregs; relayout cost is noise.
    out_acc = jnp.zeros((T * N, o_ref.shape[-1]), jnp.float32)
    for f in range(d_feature):                # d_feature is small & static
        q = qkv[:, :, f * d_ff:(f + 1) * d_ff].astype(cd)          # scale pre-folded
        k = qkv[:, :, k_off + f * d_ff:k_off + (f + 1) * d_ff].astype(cd)
        v = qkv[:, :, v_off + f * d_model:v_off + (f + 1) * d_model].astype(cd)

        s = jnp.einsum("tnd,tmd->tnm", q, k,
                       preferred_element_type=jnp.float32)         # f32 scores
        s = s - jnp.max(s, axis=-1, keepdims=True)
        e = jnp.exp(s)                                             # f32 softmax
        p = e * pl.reciprocal(jnp.sum(e, axis=-1, keepdims=True), approx=True)
        a = jnp.einsum("tnm,tmd->tnd", p.astype(cd), v,
                       preferred_element_type=jnp.float32)         # (T,N,d_model)

        # Fused back_linear + permute + last_linear: accumulate this feature's
        # contribution to the final (p, m)-laid-out output.
        out_acc = out_acc + jnp.dot(
            a.reshape(T * N, d_model).astype(cd),
            w_comb_ref[f * d_model:(f + 1) * d_model, :],
            preferred_element_type=jnp.float32)

    out = out_acc + b_comb_ref[...]
    o_ref[...] = out.reshape(T, N, o_ref.shape[-1]).astype(o_ref.dtype)


# ----------------------------------------------------------------------------
# One-time parameter fusion (hoisted out of the per-call forward).
# Weights are stored PyTorch-transposed: (in, out).
# ----------------------------------------------------------------------------
def fuse_params(params, *, d_model, compute_dtype=jnp.bfloat16):
    win, bin_ = params["input"]          # (d_model, F), (F,)
    wq, bq = params["q"]                 # (P, d_ff)
    wk, bk = params["k"]                 # (P, d_ff)
    wv, bv = params["v"]                 # (P, d_model)
    wback, bback = params["back"]        # (d_model, P)
    wlast, blast = params["last"]        # (F, d_model)

    scale = 1.0 / (d_model ** 0.5)       # fold score scale into the q branch
    wq = wq * scale
    bq = bq * scale

    def kron_front(w_proj):
        # result[(p*d_model+m), (f*dout+d)] = win[m,f] * w_proj[p,d]
        return jnp.einsum("mf,pd->pmfd", win, w_proj).reshape(
            w_proj.shape[0] * win.shape[0], win.shape[1] * w_proj.shape[1])

    def front_bias(w_proj, b_proj):
        # b[(f*dout+d)] = bin[f] * sum_p w_proj[p,d] + b_proj[d]
        return (jnp.outer(bin_, w_proj.sum(axis=0)) + b_proj[None, :]).reshape(-1)

    w_qkv = jnp.concatenate([kron_front(wq), kron_front(wk), kron_front(wv)],
                            axis=1)                      # (P*dm, F*(2*dff+dm))
    b_qkv = jnp.concatenate([front_bias(wq, bq), front_bias(wk, bk),
                             front_bias(wv, bv)])

    # W_comb[(f*dm+d), (p*dm+m)] = W_back[d,p] * W_last[f,m]
    w_comb = jnp.einsum("dp,fm->fdpm", wback, wlast).reshape(
        wlast.shape[0] * d_model, wback.shape[1] * d_model)
    b_comb = (jnp.outer(bback, wlast.sum(axis=0)) + blast[None, :]).reshape(-1)

    return {
        "w_qkv": w_qkv.astype(compute_dtype),
        "b_qkv": b_qkv.astype(jnp.float32).reshape(1, -1),
        "w_comb": w_comb.astype(compute_dtype),
        "b_comb": b_comb.astype(jnp.float32).reshape(1, -1),
    }


# ----------------------------------------------------------------------------
# Full module forward: one pallas_call, lane-dense in/out blocks.
# ----------------------------------------------------------------------------
def season_patch_attention_forward(x, fused, *, patch_len, N, d_feature,
                                   d_model, d_ff):
    # x: (B, N*patch_len, d_model)
    B = x.shape[0]
    P = patch_len
    PD = P * d_model
    x3 = x.reshape(B, N, PD)                  # free, contiguous

    w_qkv, b_qkv = fused["w_qkv"], fused["b_qkv"]
    w_comb, b_comb = fused["w_comb"], fused["b_comb"]
    Ctot = w_qkv.shape[1]                     # d_feature * (2*d_ff + d_model)

    itm = jnp.dtype(x.dtype).itemsize
    wt_itm = jnp.dtype(w_qkv.dtype).itemsize
    # Per-batch-row VMEM footprint incl. double-buffered x/out slabs and the
    # f32 in-kernel intermediates (qkv, per-f temporaries, output accumulator).
    per_b = (2 * N * PD * itm) + (2 * N * PD * itm) + (N * Ctot * 4) \
        + (N * (2 * d_ff + d_model) * 4) + (2 * N * N * 4) + (N * d_model * 4) \
        + (N * PD * 4)
    fixed = 2 * wt_itm * (w_qkv.size + w_comb.size) \
        + 2 * 4 * (b_qkv.size + b_comb.size)

    n_cores = _num_tensorcores()
    b_tile = _pick_b_tile(B, per_b, fixed, n_cores, _vmem_budget_bytes())
    grid = (pl.cdiv(B, b_tile),)

    kernel = functools.partial(_season_attn_kernel, d_feature=d_feature,
                               d_ff=d_ff, d_model=d_model)

    flops = (2 * B * N * PD * Ctot
             + 2 * B * d_feature * N * N * (d_ff + d_model)
             + 2 * B * N * d_feature * d_model * PD)
    bytes_accessed = (x.size * itm + B * N * PD * itm
                      + (w_qkv.size + w_comb.size) * wt_itm
                      + (b_qkv.size + b_comb.size) * 4)
    cost = pl.CostEstimate(flops=flops,
                           transcendentals=B * d_feature * N * N,
                           bytes_accessed=bytes_accessed)

    out = pl.pallas_call(
        kernel,
        out_shape=jax.ShapeDtypeStruct((B, N, PD), x.dtype),
        grid=grid,
        in_specs=[
            pl.BlockSpec((b_tile, N, PD), lambda i: (i, 0, 0)),
            pl.BlockSpec((PD, Ctot), lambda i: (0, 0)),
            pl.BlockSpec((1, Ctot), lambda i: (0, 0)),
            pl.BlockSpec((d_feature * d_model, PD), lambda i: (0, 0)),
            pl.BlockSpec((1, PD), lambda i: (0, 0)),
        ],
        out_specs=pl.BlockSpec((b_tile, N, PD), lambda i: (i, 0, 0)),
        compiler_params=pltpu.CompilerParams(
            dimension_semantics=("parallel",),
            vmem_limit_bytes=32 * 1024 * 1024),
        cost_estimate=cost,
    )(x3, w_qkv, b_qkv, w_comb, b_comb)

    return out.reshape(B * N, P, d_model)


# ----------------------------------------------------------------------------
# Deterministic parameter init (matching nn.Linear shapes; weights stored
# pre-transposed as (in, out))
# ----------------------------------------------------------------------------
def init_params(key, patch_len, N, d_feature, d_model, d_ff):
    keys = jax.random.split(key, 12)

    def lin(kw, kb, fan_in, fan_out):
        bound = 1.0 / (fan_in ** 0.5)
        w = jax.random.uniform(kw, (fan_in, fan_out), jnp.float32, -bound, bound)
        b = jax.random.uniform(kb, (fan_out,), jnp.float32, -bound, bound)
        return w, b

    return {
        "input": lin(keys[0], keys[1], d_model, d_feature),
        "q":     lin(keys[2], keys[3], patch_len, d_ff),
        "k":     lin(keys[4], keys[5], patch_len, d_ff),
        "v":     lin(keys[6], keys[7], patch_len, d_model),
        "back":  lin(keys[8], keys[9], d_model, patch_len),
        "last":  lin(keys[10], keys[11], d_feature, d_model),
    }


# ----------------------------------------------------------------------------
# Pure-JAX reference (mirrors the PyTorch forward exactly)
# ----------------------------------------------------------------------------
def reference_forward(x, params, *, patch_len, N, d_feature, d_model, d_ff):
    B = x.shape[0]
    h = x @ params["input"][0] + params["input"][1]
    h = h.reshape(B, N, patch_len, d_feature)
    h = jnp.transpose(h, (0, 3, 1, 2)).reshape(-1, N, patch_len)
    q = h @ params["q"][0] + params["q"][1]
    k = h @ params["k"][0] + params["k"][1]
    v = h @ params["v"][0] + params["v"][1]
    score = jax.nn.softmax(
        jnp.einsum("bnf,bmf->bnm", q, k) / (d_model ** 0.5), axis=-1)
    attn = jnp.einsum("bnm,bmd->bnd", score, v)
    back = attn @ params["back"][0] + params["back"][1]
    back = back.reshape(B, d_feature, N, patch_len)
    back = jnp.transpose(back, (0, 2, 3, 1)).reshape(-1, patch_len, d_feature)
    return back @ params["last"][0] + params["last"][1]


if __name__ == "__main__":
    # Small, module-consistent shapes.
    B, N, patch_len = 2, 8, 16
    d_feature, d_model, d_ff = 4, 32, 32

    key = jax.random.PRNGKey(0)
    k_x, k_p = jax.random.split(key)
    x = jax.random.normal(k_x, (B, N * patch_len, d_model), dtype=jnp.float32)
    params = init_params(k_p, patch_len, N, d_feature, d_model, d_ff)

    ref = reference_forward(
        x, params, patch_len=patch_len, N=N, d_feature=d_feature,
        d_model=d_model, d_ff=d_ff)

    fwd = jax.jit(functools.partial(
        season_patch_attention_forward, patch_len=patch_len, N=N,
        d_feature=d_feature, d_model=d_model, d_ff=d_ff))

    # f32 MXU operands: tight parity check (only approx-reciprocal softmax
    # and weight-fusion reassociation differ from the reference).
    fused32 = fuse_params(params, d_model=d_model, compute_dtype=jnp.float32)
    out32 = jax.block_until_ready(fwd(x, fused32))
    assert out32.shape == (B * N, patch_len, d_model), out32.shape
    err32 = float(jnp.max(jnp.abs(out32 - ref)))
    assert err32 < 5e-3, f"f32 path mismatch vs reference: max abs err = {err32}"

    # bf16 MXU operands (perf default for v5e/v6e/v7x); accumulation and
    # softmax stay f32, so only operand-rounding error is added.
    fused16 = fuse_params(params, d_model=d_model, compute_dtype=jnp.bfloat16)
    out16 = jax.block_until_ready(fwd(x, fused16))
    err16 = float(jnp.max(jnp.abs(out16 - ref)))
    assert err16 < 6e-2, f"bf16 path mismatch vs reference: max abs err = {err16}"

    print("KERNEL_OK")
</pallas_src>

<mosaic_0001>
module attributes {stable_mosaic.version = 11 : i64} {
  func.func @_season_attn_kernel(%arg0: i32, %arg1: memref<2x8x512xf32, #tpu.memory_space<vmem>>, %arg2: memref<512x384xf32, #tpu.memory_space<vmem>>, %arg3: memref<1x384xf32, #tpu.memory_space<vmem>>, %arg4: memref<128x512xf32, #tpu.memory_space<vmem>>, %arg5: memref<1x512xf32, #tpu.memory_space<vmem>>, %arg6: memref<2x8x512xf32, #tpu.memory_space<vmem>>) attributes {dimension_semantics = [#tpu.dimension_semantics<parallel>], iteration_bounds = array<i64: 1>, scalar_prefetch = 0 : i64, scratch_operands = 0 : i64, tpu.core_type = #tpu.core_type<tc>, window_params = [{transform_indices = @transform_0, window_bounds = array<i64: 2, 8, 512>}, {pipeline_mode = #tpu.pipeline_mode<synchronous>, transform_indices = @transform_1, window_bounds = array<i64: 512, 384>}, {pipeline_mode = #tpu.pipeline_mode<synchronous>, transform_indices = @transform_2, window_bounds = array<i64: 1, 384>}, {pipeline_mode = #tpu.pipeline_mode<synchronous>, transform_indices = @transform_3, window_bounds = array<i64: 128, 512>}, {pipeline_mode = #tpu.pipeline_mode<synchronous>, transform_indices = @transform_4, window_bounds = array<i64: 1, 512>}, {transform_indices = @transform_5, window_bounds = array<i64: 2, 8, 512>}]} {
    %c0 = arith.constant 0 : index
    %c0_0 = arith.constant 0 : index
    %c0_1 = arith.constant 0 : index
    %0 = vector.load %arg1[%c0, %c0_0, %c0_1] : memref<2x8x512xf32, #tpu.memory_space<vmem>>, vector<2x8x512xf32>
    %1 = vector.shape_cast %0 : vector<2x8x512xf32> to vector<16x512xf32>
    %c0_2 = arith.constant 0 : index
    %c0_3 = arith.constant 0 : index
    %2 = vector.load %arg2[%c0_2, %c0_3] : memref<512x384xf32, #tpu.memory_space<vmem>>, vector<512x384xf32>
    %cst = arith.constant dense<0.000000e+00> : vector<16x384xf32>
    %3 = tpu.matmul %1, %2, %cst {dimension_numbers = #tpu.dot_dimension_numbers<[1], [0], [0], [1], [0, 0, 1, 1], [], []>} : vector<16x512xf32>, vector<512x384xf32>, vector<16x384xf32> -> vector<16x384xf32>
    %c0_4 = arith.constant 0 : index
    %c0_5 = arith.constant 0 : index
    %4 = vector.load %arg3[%c0_4, %c0_5] : memref<1x384xf32, #tpu.memory_space<vmem>>, vector<1x384xf32>
    %5 = vector.broadcast %4 : vector<1x384xf32> to vector<16x384xf32>
    %6 = arith.addf %3, %5 : vector<16x384xf32>
    %7 = vector.shape_cast %6 : vector<16x384xf32> to vector<2x8x384xf32>
    %cst_6 = arith.constant 0.000000e+00 : f32
    %8 = vector.broadcast %cst_6 : f32 to vector<16x512xf32>
    %9 = vector.extract_strided_slice %7 {offsets = [0, 0, 0], sizes = [2, 8, 32], strides = [1, 1, 1]} : vector<2x8x384xf32> to vector<2x8x32xf32>
    %10 = vector.extract_strided_slice %7 {offsets = [0, 0, 128], sizes = [2, 8, 32], strides = [1, 1, 1]} : vector<2x8x384xf32> to vector<2x8x32xf32>
    %11 = vector.extract_strided_slice %7 {offsets = [0, 0, 256], sizes = [2, 8, 32], strides = [1, 1, 1]} : vector<2x8x384xf32> to vector<2x8x32xf32>
    "tpu.trace_start"() <{level = 10 : i32, message = "tnd,tmd->tnm"}> : () -> ()
    %cst_7 = arith.constant dense<0.000000e+00> : vector<2x8x8xf32>
    %12 = tpu.matmul %9, %10, %cst_7 {dimension_numbers = #tpu.dot_dimension_numbers<[2], [2], [1], [1], [0, 0, 0, 1, 1, 1], [0], [0]>} : vector<2x8x32xf32>, vector<2x8x32xf32>, vector<2x8x8xf32> -> vector<2x8x8xf32>
    "tpu.trace_stop"() : () -> ()
    %cst_8 = arith.constant dense<0xFF800000> : vector<2x8xf32>
    %13 = vector.multi_reduction <maximumf>, %12, %cst_8 [2] : vector<2x8x8xf32> to vector<2x8xf32>
    %14 = vector.shape_cast %13 : vector<2x8xf32> to vector<2x8x1xf32>
    %15 = vector.broadcast %14 : vector<2x8x1xf32> to vector<2x8x8xf32>
    %16 = arith.subf %12, %15 : vector<2x8x8xf32>
    %17 = math.exp %16 : vector<2x8x8xf32>
    %cst_9 = arith.constant dense<0.000000e+00> : vector<2x8xf32>
    %18 = vector.multi_reduction <add>, %17, %cst_9 [2] : vector<2x8x8xf32> to vector<2x8xf32>
    %19 = vector.shape_cast %18 : vector<2x8xf32> to vector<2x8x1xf32>
    %20 = tpu.reciprocal %19 {approx = true} : vector<2x8x1xf32> -> vector<2x8x1xf32>
    %21 = vector.broadcast %20 : vector<2x8x1xf32> to vector<2x8x8xf32>
    %22 = arith.mulf %17, %21 : vector<2x8x8xf32>
    "tpu.trace_start"() <{level = 10 : i32, message = "tnm,tmd->tnd"}> : () -> ()
    %cst_10 = arith.constant dense<0.000000e+00> : vector<2x8x32xf32>
    %23 = tpu.matmul %22, %11, %cst_10 {dimension_numbers = #tpu.dot_dimension_numbers<[2], [1], [1], [2], [0, 0, 0, 1, 1, 2], [0], [0]>} : vector<2x8x8xf32>, vector<2x8x32xf32>, vector<2x8x32xf32> -> vector<2x8x32xf32>
    "tpu.trace_stop"() : () -> ()
    %24 = vector.shape_cast %23 : vector<2x8x32xf32> to vector<16x32xf32>
    %c0_11 = arith.constant 0 : index
    %c0_12 = arith.constant 0 : index
    %25 = vector.load %arg4[%c0_11, %c0_12] : memref<128x512xf32, #tpu.memory_space<vmem>>, vector<32x512xf32>
    %cst_13 = arith.constant dense<0.000000e+00> : vector<16x512xf32>
    %26 = tpu.matmul %24, %25, %cst_13 {dimension_numbers = #tpu.dot_dimension_numbers<[1], [0], [0], [1], [0, 0, 1, 1], [], []>} : vector<16x32xf32>, vector<32x512xf32>, vector<16x512xf32> -> vector<16x512xf32>
    %27 = arith.addf %8, %26 : vector<16x512xf32>
    %28 = vector.extract_strided_slice %7 {offsets = [0, 0, 32], sizes = [2, 8, 32], strides = [1, 1, 1]} : vector<2x8x384xf32> to vector<2x8x32xf32>
    %29 = vector.extract_strided_slice %7 {offsets = [0, 0, 160], sizes = [2, 8, 32], strides = [1, 1, 1]} : vector<2x8x384xf32> to vector<2x8x32xf32>
    %30 = vector.extract_strided_slice %7 {offsets = [0, 0, 288], sizes = [2, 8, 32], strides = [1, 1, 1]} : vector<2x8x384xf32> to vector<2x8x32xf32>
    "tpu.trace_start"() <{level = 10 : i32, message = "tnd,tmd->tnm"}> : () -> ()
    %cst_14 = arith.constant dense<0.000000e+00> : vector<2x8x8xf32>
    %31 = tpu.matmul %28, %29, %cst_14 {dimension_numbers = #tpu.dot_dimension_numbers<[2], [2], [1], [1], [0, 0, 0, 1, 1, 1], [0], [0]>} : vector<2x8x32xf32>, vector<2x8x32xf32>, vector<2x8x8xf32> -> vector<2x8x8xf32>
    "tpu.trace_stop"() : () -> ()
    %cst_15 = arith.constant dense<0xFF800000> : vector<2x8xf32>
    %32 = vector.multi_reduction <maximumf>, %31, %cst_15 [2] : vector<2x8x8xf32> to vector<2x8xf32>
    %33 = vector.shape_cast %32 : vector<2x8xf32> to vector<2x8x1xf32>
    %34 = vector.broadcast %33 : vector<2x8x1xf32> to vector<2x8x8xf32>
    %35 = arith.subf %31, %34 : vector<2x8x8xf32>
    %36 = math.exp %35 : vector<2x8x8xf32>
    %cst_16 = arith.constant dense<0.000000e+00> : vector<2x8xf32>
    %37 = vector.multi_reduction <add>, %36, %cst_16 [2] : vector<2x8x8xf32> to vector<2x8xf32>
    %38 = vector.shape_cast %37 : vector<2x8xf32> to vector<2x8x1xf32>
    %39 = tpu.reciprocal %38 {approx = true} : vector<2x8x1xf32> -> vector<2x8x1xf32>
    %40 = vector.broadcast %39 : vector<2x8x1xf32> to vector<2x8x8xf32>
    %41 = arith.mulf %36, %40 : vector<2x8x8xf32>
    "tpu.trace_start"() <{level = 10 : i32, message = "tnm,tmd->tnd"}> : () -> ()
    %cst_17 = arith.constant dense<0.000000e+00> : vector<2x8x32xf32>
    %42 = tpu.matmul %41, %30, %cst_17 {dimension_numbers = #tpu.dot_dimension_numbers<[2], [1], [1], [2], [0, 0, 0, 1, 1, 2], [0], [0]>} : vector<2x8x8xf32>, vector<2x8x32xf32>, vector<2x8x32xf32> -> vector<2x8x32xf32>
    "tpu.trace_stop"() : () -> ()
    %43 = vector.shape_cast %42 : vector<2x8x32xf32> to vector<16x32xf32>
    %c32 = arith.constant 32 : index
    %c0_18 = arith.constant 0 : index
    %44 = vector.load %arg4[%c32, %c0_18] : memref<128x512xf32, #tpu.memory_space<vmem>>, vector<32x512xf32>
    %cst_19 = arith.constant dense<0.000000e+00> : vector<16x512xf32>
    %45 = tpu.matmul %43, %44, %cst_19 {dimension_numbers = #tpu.dot_dimension_numbers<[1], [0], [0], [1], [0, 0, 1, 1], [], []>} : vector<16x32xf32>, vector<32x512xf32>, vector<16x512xf32> -> vector<16x512xf32>
    %46 = arith.addf %27, %45 : vector<16x512xf32>
    %47 = vector.extract_strided_slice %7 {offsets = [0, 0, 64], sizes = [2, 8, 32], strides = [1, 1, 1]} : vector<2x8x384xf32> to vector<2x8x32xf32>
    %48 = vector.extract_strided_slice %7 {offsets = [0, 0, 192], sizes = [2, 8, 32], strides = [1, 1, 1]} : vector<2x8x384xf32> to vector<2x8x32xf32>
    %49 = vector.extract_strided_slice %7 {offsets = [0, 0, 320], sizes = [2, 8, 32], strides = [1, 1, 1]} : vector<2x8x384xf32> to vector<2x8x32xf32>
    "tpu.trace_start"() <{level = 10 : i32, message = "tnd,tmd->tnm"}> : () -> ()
    %cst_20 = arith.constant dense<0.000000e+00> : vector<2x8x8xf32>
    %50 = tpu.matmul %47, %48, %cst_20 {dimension_numbers = #tpu.dot_dimension_numbers<[2], [2], [1], [1], [0, 0, 0, 1, 1, 1], [0], [0]>} : vector<2x8x32xf32>, vector<2x8x32xf32>, vector<2x8x8xf32> -> vector<2x8x8xf32>
    "tpu.trace_stop"() : () -> ()
    %cst_21 = arith.constant dense<0xFF800000> : vector<2x8xf32>
    %51 = vector.multi_reduction <maximumf>, %50, %cst_21 [2] : vector<2x8x8xf32> to vector<2x8xf32>
    %52 = vector.shape_cast %51 : vector<2x8xf32> to vector<2x8x1xf32>
    %53 = vector.broadcast %52 : vector<2x8x1xf32> to vector<2x8x8xf32>
    %54 = arith.subf %50, %53 : vector<2x8x8xf32>
    %55 = math.exp %54 : vector<2x8x8xf32>
    %cst_22 = arith.constant dense<0.000000e+00> : vector<2x8xf32>
    %56 = vector.multi_reduction <add>, %55, %cst_22 [2] : vector<2x8x8xf32> to vector<2x8xf32>
    %57 = vector.shape_cast %56 : vector<2x8xf32> to vector<2x8x1xf32>
    %58 = tpu.reciprocal %57 {approx = true} : vector<2x8x1xf32> -> vector<2x8x1xf32>
    %59 = vector.broadcast %58 : vector<2x8x1xf32> to vector<2x8x8xf32>
    %60 = arith.mulf %55, %59 : vector<2x8x8xf32>
    "tpu.trace_start"() <{level = 10 : i32, message = "tnm,tmd->tnd"}> : () -> ()
    %cst_23 = arith.constant dense<0.000000e+00> : vector<2x8x32xf32>
    %61 = tpu.matmul %60, %49, %cst_23 {dimension_numbers = #tpu.dot_dimension_numbers<[2], [1], [1], [2], [0, 0, 0, 1, 1, 2], [0], [0]>} : vector<2x8x8xf32>, vector<2x8x32xf32>, vector<2x8x32xf32> -> vector<2x8x32xf32>
    "tpu.trace_stop"() : () -> ()
    %62 = vector.shape_cast %61 : vector<2x8x32xf32> to vector<16x32xf32>
    %c64 = arith.constant 64 : index
    %c0_24 = arith.constant 0 : index
    %63 = vector.load %arg4[%c64, %c0_24] : memref<128x512xf32, #tpu.memory_space<vmem>>, vector<32x512xf32>
    %cst_25 = arith.constant dense<0.000000e+00> : vector<16x512xf32>
    %64 = tpu.matmul %62, %63, %cst_25 {dimension_numbers = #tpu.dot_dimension_numbers<[1], [0], [0], [1], [0, 0, 1, 1], [], []>} : vector<16x32xf32>, vector<32x512xf32>, vector<16x512xf32> -> vector<16x512xf32>
    %65 = arith.addf %46, %64 : vector<16x512xf32>
    %66 = vector.extract_strided_slice %7 {offsets = [0, 0, 96], sizes = [2, 8, 32], strides = [1, 1, 1]} : vector<2x8x384xf32> to vector<2x8x32xf32>
    %67 = vector.extract_strided_slice %7 {offsets = [0, 0, 224], sizes = [2, 8, 32], strides = [1, 1, 1]} : vector<2x8x384xf32> to vector<2x8x32xf32>
    %68 = vector.extract_strided_slice %7 {offsets = [0, 0, 352], sizes = [2, 8, 32], strides = [1, 1, 1]} : vector<2x8x384xf32> to vector<2x8x32xf32>
    "tpu.trace_start"() <{level = 10 : i32, message = "tnd,tmd->tnm"}> : () -> ()
    %cst_26 = arith.constant dense<0.000000e+00> : vector<2x8x8xf32>
    %69 = tpu.matmul %66, %67, %cst_26 {dimension_numbers = #tpu.dot_dimension_numbers<[2], [2], [1], [1], [0, 0, 0, 1, 1, 1], [0], [0]>} : vector<2x8x32xf32>, vector<2x8x32xf32>, vector<2x8x8xf32> -> vector<2x8x8xf32>
    "tpu.trace_stop"() : () -> ()
    %cst_27 = arith.constant dense<0xFF800000> : vector<2x8xf32>
    %70 = vector.multi_reduction <maximumf>, %69, %cst_27 [2] : vector<2x8x8xf32> to vector<2x8xf32>
    %71 = vector.shape_cast %70 : vector<2x8xf32> to vector<2x8x1xf32>
    %72 = vector.broadcast %71 : vector<2x8x1xf32> to vector<2x8x8xf32>
    %73 = arith.subf %69, %72 : vector<2x8x8xf32>
    %74 = math.exp %73 : vector<2x8x8xf32>
    %cst_28 = arith.constant dense<0.000000e+00> : vector<2x8xf32>
    %75 = vector.multi_reduction <add>, %74, %cst_28 [2] : vector<2x8x8xf32> to vector<2x8xf32>
    %76 = vector.shape_cast %75 : vector<2x8xf32> to vector<2x8x1xf32>
    %77 = tpu.reciprocal %76 {approx = true} : vector<2x8x1xf32> -> vector<2x8x1xf32>
    %78 = vector.broadcast %77 : vector<2x8x1xf32> to vector<2x8x8xf32>
    %79 = arith.mulf %74, %78 : vector<2x8x8xf32>
    "tpu.trace_start"() <{level = 10 : i32, message = "tnm,tmd->tnd"}> : () -> ()
    %cst_29 = arith.constant dense<0.000000e+00> : vector<2x8x32xf32>
    %80 = tpu.matmul %79, %68, %cst_29 {dimension_numbers = #tpu.dot_dimension_numbers<[2], [1], [1], [2], [0, 0, 0, 1, 1, 2], [0], [0]>} : vector<2x8x8xf32>, vector<2x8x32xf32>, vector<2x8x32xf32> -> vector<2x8x32xf32>
    "tpu.trace_stop"() : () -> ()
    %81 = vector.shape_cast %80 : vector<2x8x32xf32> to vector<16x32xf32>
    %c96 = arith.constant 96 : index
    %c0_30 = arith.constant 0 : index
    %82 = vector.load %arg4[%c96, %c0_30] : memref<128x512xf32, #tpu.memory_space<vmem>>, vector<32x512xf32>
    %cst_31 = arith.constant dense<0.000000e+00> : vector<16x512xf32>
    %83 = tpu.matmul %81, %82, %cst_31 {dimension_numbers = #tpu.dot_dimension_numbers<[1], [0], [0], [1], [0, 0, 1, 1], [], []>} : vector<16x32xf32>, vector<32x512xf32>, vector<16x512xf32> -> vector<16x512xf32>
    %84 = arith.addf %65, %83 : vector<16x512xf32>
    %c0_32 = arith.constant 0 : index
    %c0_33 = arith.constant 0 : index
    %85 = vector.load %arg5[%c0_32, %c0_33] : memref<1x512xf32, #tpu.memory_space<vmem>>, vector<1x512xf32>
    %86 = vector.broadcast %85 : vector<1x512xf32> to vector<16x512xf32>
    %87 = arith.addf %84, %86 : vector<16x512xf32>
    %88 = vector.shape_cast %87 : vector<16x512xf32> to vector<2x8x512xf32>
    %c0_34 = arith.constant 0 : index
    %c0_35 = arith.constant 0 : index
    %c0_36 = arith.constant 0 : index
    %89 = vector.load %arg6[%c0_34, %c0_35, %c0_36] : memref<2x8x512xf32, #tpu.memory_space<vmem>>, vector<2x8x512xf32>
    tpu.vector_store %arg6[%c0_34, %c0_35, %c0_36], %88 {strides = array<i32>} : memref<2x8x512xf32, #tpu.memory_space<vmem>>, vector<2x8x512xf32>,
    return
  }
  func.func @transform_0(%arg0: i32) -> (i32, i32, i32) {
    %c0_i32 = arith.constant 0 : i32
    %c0_i32_0 = arith.constant 0 : i32
    %c0_i32_1 = arith.constant 0 : i32
    return %arg0, %c0_i32, %c0_i32_0 : i32, i32, i32
  }
  func.func @transform_1(%arg0: i32) -> (i32, i32) {
    %c0_i32 = arith.constant 0 : i32
    %c0_i32_0 = arith.constant 0 : i32
    %c0_i32_1 = arith.constant 0 : i32
    return %c0_i32, %c0_i32_0 : i32, i32
  }
  func.func @transform_2(%arg0: i32) -> (i32, i32) {
    %c0_i32 = arith.constant 0 : i32
    %c0_i32_0 = arith.constant 0 : i32
    %c0_i32_1 = arith.constant 0 : i32
    return %c0_i32, %c0_i32_0 : i32, i32
  }
  func.func @transform_3(%arg0: i32) -> (i32, i32) {
    %c0_i32 = arith.constant 0 : i32
    %c0_i32_0 = arith.constant 0 : i32
    %c0_i32_1 = arith.constant 0 : i32
    return %c0_i32, %c0_i32_0 : i32, i32
  }
  func.func @transform_4(%arg0: i32) -> (i32, i32) {
    %c0_i32 = arith.constant 0 : i32
    %c0_i32_0 = arith.constant 0 : i32
    %c0_i32_1 = arith.constant 0 : i32
    return %c0_i32, %c0_i32_0 : i32, i32
  }
  func.func @transform_5(%arg0: i32) -> (i32, i32, i32) {
    %c0_i32 = arith.constant 0 : i32
    %c0_i32_0 = arith.constant 0 : i32
    %c0_i32_1 = arith.constant 0 : i32
    return %arg0, %c0_i32, %c0_i32_0 : i32, i32, i32
  }
}

</mosaic_0001>

<bundles_post_ra>
// kernel: season_patch_attention_forward.1
= control target key start
LH: loop header
LB: loop body
LE: loop exit
PB: predicated region body
PF: predicated region fallthrough
CT: control target
= control target key end

     0   :  { %10 = vsyncpa [#allocation3], 0  ;;  %s2922_s18 = smov [#allocation2]   ;;  %s3489_s0 = inlined_call_operand.vmem [shape: f32[2,8,512], index: 0, kind: input, shape index: {}]   ;;  %s3490_s1 = inlined_call_operand.hbm [shape: f32[512,384], index: 1, kind: input, shape index: {}]   ;;  %s3491_s2 = inlined_call_operand.vmem [shape: f32[1,384], index: 2, kind: input, shape index: {}]   ;;  %s3492_s3 = inlined_call_operand.vmem [shape: f32[128,512], index: 3, kind: input, shape index: {}]   ;;  %s3493_s4 = inlined_call_operand.vmem [shape: f32[1,512], index: 4, kind: input, shape index: {}]   ;;  %s3494_s5 = inlined_call_operand.vmem [shape: f32[2,8,512], index: 5, kind: output, shape index: {}]  }
   0x1   :  { %s18_s19 = sshll.u32 %s2922_s18, 4  ;;  %s19_s19 = int_to_ptr.vmem [resolvable:$true] %s18_s19 }
   0x2   :  { %s2908_s20 = scalar_lea.vmem %s19_s19, 24576  ;;  %p2913_p1 = scmp.lt.s32.totalorder %s19_s19, %s19_s19 }
   0x3   :  { %p2909_p0 = scmp.ne.s32.totalorder %s19_s19, %s2908_s20  ;;  %p2914_p2 = scmp.lt.s32.totalorder %s2908_s20, %s2908_s20 }
   0x5   :  { %p2915_p3 = por %p2914_p2, %p2913_p1 }
   0x7   :  { %p2916_p4 = pnand %p2915_p3, %p2909_p0 }
   0x9   :  { %2919 = shalt.err (!%p2916_p4)
}
   0xa   :  { %s2923_s21 = smov 384   ;;  %s2924_s22 = smov 24  }
   0xb   :  { %24 = dma.hbm_to_vmem [thread:$0]  %s3490_s1, 24576, %s19_s19, [#allocation3], %s2923_s21, %s2923_s21, %s2924_s22  }
   0xc   :  { %2920 = dma.done.wait [#allocation3], 24576  }
   0xd   :  { %2921 = vsyncadd [#allocation3], 4294942720  ;;  %v88_v0 = vld [vmem:[#allocation2 + $0x170] sm:$0xff]  ;;  %v87_v2 = vld [vmem:[#allocation2 + $0x168] sm:$0xff]  ;;  %vm2926_vm0 = vmmov 0   ;;  %vm555_vm1 = vcmask 261120  }
   0xe   :  { %v184_v1 = vld [vmem:[#allocation2 + $0x470] sm:$0xff]  ;;  %251 = vmatprep.subr.mxu0 %v88_v0  ;;  %v183_v3 = vld [vmem:[#allocation2 + $0x468] sm:$0xff]  ;;  %v85_v4 = vld [vmem:[#allocation2 + $0x158] sm:$0xff]  ;;  %vm708_vm2 = vcmask 64512   ;;  %s2928_s16 = smov 64   ;;  %s2929_s26 = smov 32  }
   0xf   :  { %328 = vmatprep.subr.mxu1 %v184_v1  ;;  %v181_v5 = vld [vmem:[#allocation2 + $0x458] sm:$0xff]  ;;  %252 = vmatpush1.msra.mxu0 %v87_v2  ;;  %v84_v6 = vld [vmem:[#allocation2 + $0x150] sm:$0xff]  ;;  %v82_v8 = vld [vmem:[#allocation2 + $0x140] sm:$0xff] }
  0x10   :  { %329 = vmatpush1.msra.mxu1 %v183_v3  ;;  %v180_v7 = vld [vmem:[#allocation2 + $0x450] sm:$0xff]  ;;  %253 = vmatprep.subr.mxu0 %v85_v4  ;;  %v178_v9 = vld [vmem:[#allocation2 + $0x440] sm:$0xff]  ;;  %v81_v10 = vld [vmem:[#allocation2 + $0x138] sm:$0xff] }
  0x11   :  { %330 = vmatprep.subr.mxu1 %v181_v5  ;;  %v177_v11 = vld [vmem:[#allocation2 + $0x438] sm:$0xff]  ;;  %254 = vmatpush1.msra.mxu0 %v84_v6  ;;  %v79_v12 = vld [vmem:[#allocation2 + $0x128] sm:$0xff]  ;;  %v78_v14 = vld [vmem:[#allocation2 + $0x120] sm:$0xff] }
  0x12   :  { %331 = vmatpush1.msra.mxu1 %v180_v7  ;;  %v175_v13 = vld [vmem:[#allocation2 + $0x428] sm:$0xff]  ;;  %255 = vmatprep.subr.mxu0 %v82_v8  ;;  %v174_v15 = vld [vmem:[#allocation2 + $0x420] sm:$0xff]  ;;  %v76_v16 = vld [vmem:[#allocation2 + $0x110] sm:$0xff] }
  0x13   :  { %332 = vmatprep.subr.mxu1 %v178_v9  ;;  %256 = vmatpush1.msra.mxu0 %v81_v10  ;;  %v172_v17 = vld [vmem:[#allocation2 + $0x410] sm:$0xff]  ;;  %v75_v18 = vld [vmem:[#allocation2 + $0x108] sm:$0xff]  ;;  %v73_v20 = vld [vmem:[#allocation2 + $0xf8] sm:$0xff] }
  0x14   :  { %333 = vmatpush1.msra.mxu1 %v177_v11  ;;  %257 = vmatprep.subr.mxu0 %v79_v12  ;;  %v171_v19 = vld [vmem:[#allocation2 + $0x408] sm:$0xff]  ;;  %v169_v21 = vld [vmem:[#allocation2 + $0x3f8] sm:$0xff]  ;;  %v72_v22 = vld [vmem:[#allocation2 + $0xf0] sm:$0xff] }
  0x15   :  { %334 = vmatprep.subr.mxu1 %v175_v13  ;;  %258 = vmatpush1.msra.mxu0 %v78_v14  ;;  %v168_v23 = vld [vmem:[#allocation2 + $0x3f0] sm:$0xff]  ;;  %v70_v24 = vld [vmem:[#allocation2 + $0xe0] sm:$0xff]  ;;  %v69_v26 = vld [vmem:[#allocation2 + $0xd8] sm:$0xff] }
  0x16   :  { %335 = vmatpush1.msra.mxu1 %v174_v15  ;;  %259 = vmatprep.subr.mxu0 %v76_v16  ;;  %v166_v25 = vld [vmem:[#allocation2 + $0x3e0] sm:$0xff]  ;;  %v165_v27 = vld [vmem:[#allocation2 + $0x3d8] sm:$0xff]  ;;  %v67_v28 = vld [vmem:[#allocation2 + $0xc8] sm:$0xff] }
  0x17   :  { %336 = vmatprep.subr.mxu1 %v172_v17  ;;  %260 = vmatpush1.msra.mxu0 %v75_v18  ;;  %v163_v29 = vld [vmem:[#allocation2 + $0x3c8] sm:$0xff]  ;;  %v66_v30 = vld [vmem:[#allocation2 + $0xc0] sm:$0xff]  ;;  %v64_v32 = vld [vmem:[#allocation2 + $0xb0] sm:$0xff] }
  0x18   :  { %337 = vmatpush1.msra.mxu1 %v171_v19  ;;  %261 = vmatprep.subr.mxu0 %v73_v20  ;;  %v162_v31 = vld [vmem:[#allocation2 + $0x3c0] sm:$0xff]  ;;  %v160_v33 = vld [vmem:[#allocation2 + $0x3b0] sm:$0xff]  ;;  %v63_v34 = vld [vmem:[#allocation2 + $0xa8] sm:$0xff] }
  0x19   :  { %338 = vmatprep.subr.mxu1 %v169_v21  ;;  %262 = vmatpush1.msra.mxu0 %v72_v22  ;;  %v159_v35 = vld [vmem:[#allocation2 + $0x3a8] sm:$0xff]  ;;  %v61_v36 = vld [vmem:[#allocation2 + $0x98] sm:$0xff]  ;;  %v60_v38 = vld [vmem:[#allocation2 + $0x90] sm:$0xff] }
  0x1a   :  { %339 = vmatpush1.msra.mxu1 %v168_v23  ;;  %263 = vmatprep.subr.mxu0 %v70_v24  ;;  %v157_v37 = vld [vmem:[#allocation2 + $0x398] sm:$0xff]  ;;  %v156_v39 = vld [vmem:[#allocation2 + $0x390] sm:$0xff]  ;;  %v58_v40 = vld [vmem:[#allocation2 + $0x80] sm:$0xff] }
  0x1b   :  { %340 = vmatprep.subr.mxu1 %v166_v25  ;;  %264 = vmatpush1.msra.mxu0 %v69_v26  ;;  %v154_v41 = vld [vmem:[#allocation2 + $0x380] sm:$0xff]  ;;  %v57_v42 = vld [vmem:[#allocation2 + $0x78] sm:$0xff]  ;;  %v55_v44 = vld [vmem:[#allocation2 + $0x68] sm:$0xff] }
  0x1c   :  { %341 = vmatpush1.msra.mxu1 %v165_v27  ;;  %265 = vmatprep.subr.mxu0 %v67_v28  ;;  %v153_v43 = vld [vmem:[#allocation2 + $0x378] sm:$0xff]  ;;  %v151_v45 = vld [vmem:[#allocation2 + $0x368] sm:$0xff]  ;;  %v54_v46 = vld [vmem:[#allocation2 + $0x60] sm:$0xff] }
  0x1d   :  { %342 = vmatprep.subr.mxu1 %v163_v29  ;;  %266 = vmatpush1.msra.mxu0 %v66_v30  ;;  %v150_v47 = vld [vmem:[#allocation2 + $0x360] sm:$0xff]  ;;  %v52_v48 = vld [vmem:[#allocation2 + $0x50] sm:$0xff]  ;;  %v51_v50 = vld [vmem:[#allocation2 + $0x48] sm:$0xff] }
  0x1e   :  { %343 = vmatpush1.msra.mxu1 %v162_v31  ;;  %267 = vmatprep.subr.mxu0 %v64_v32  ;;  %v148_v49 = vld [vmem:[#allocation2 + $0x350] sm:$0xff]  ;;  %v147_v51 = vld [vmem:[#allocation2 + $0x348] sm:$0xff]  ;;  %v49_v52 = vld [vmem:[#allocation2 + $0x38] sm:$0xff] }
  0x1f   :  { %344 = vmatprep.subr.mxu1 %v160_v33  ;;  %268 = vmatpush1.msra.mxu0 %v63_v34  ;;  %v145_v53 = vld [vmem:[#allocation2 + $0x338] sm:$0xff]  ;;  %v48_v54 = vld [vmem:[#allocation2 + $0x30] sm:$0xff]  ;;  %v46_v56 = vld [vmem:[#allocation2 + $0x20] sm:$0xff] }
  0x20   :  { %345 = vmatpush1.msra.mxu1 %v159_v35  ;;  %269 = vmatprep.subr.mxu0 %v61_v36  ;;  %v144_v55 = vld [vmem:[#allocation2 + $0x330] sm:$0xff]  ;;  %v142_v57 = vld [vmem:[#allocation2 + $0x320] sm:$0xff]  ;;  %v45_v58 = vld [vmem:[#allocation2 + $0x18] sm:$0xff] }
  0x21   :  { %346 = vmatprep.subr.mxu1 %v157_v37  ;;  %270 = vmatpush1.msra.mxu0 %v60_v38  ;;  %v141_v59 = vld [vmem:[#allocation2 + $0x318] sm:$0xff]  ;;  %v43_v60 = vld [vmem:[#allocation2 + $0x8] sm:$0xff]  ;;  %v42_v62 = vld [vmem:[#allocation2] sm:$0xff] }
  0x22   :  { %347 = vmatpush1.msra.mxu1 %v156_v39  ;;  %271 = vmatprep.subr.mxu0 %v58_v40  ;;  %v139_v61 = vld [vmem:[#allocation2 + $0x308] sm:$0xff]  ;;  %v138_v63 = vld [vmem:[#allocation2 + $0x300] sm:$0xff]  ;;  %v136_v0 = vld [vmem:[#allocation2 + $0x2f0] sm:$0xff] }
  0x23   :  { %348 = vmatprep.subr.mxu1 %v154_v41  ;;  %272 = vmatpush1.msra.mxu0 %v57_v42  ;;  %v232_v1 = vld [vmem:[#allocation2 + $0x5f0] sm:$0xff]  ;;  %v135_v2 = vld [vmem:[#allocation2 + $0x2e8] sm:$0xff]  ;;  %v133_v4 = vld [vmem:[#allocation2 + $0x2d8] sm:$0xff] }
  0x24   :  { %349 = vmatpush1.msra.mxu1 %v153_v43  ;;  %273 = vmatprep.subr.mxu0 %v55_v44  ;;  %v231_v3 = vld [vmem:[#allocation2 + $0x5e8] sm:$0xff]  ;;  %v229_v5 = vld [vmem:[#allocation2 + $0x5d8] sm:$0xff]  ;;  %v132_v6 = vld [vmem:[#allocation2 + $0x2d0] sm:$0xff] }
  0x25   :  { %350 = vmatprep.subr.mxu1 %v151_v45  ;;  %274 = vmatpush1.msra.mxu0 %v54_v46  ;;  %v228_v7 = vld [vmem:[#allocation2 + $0x5d0] sm:$0xff]  ;;  %v130_v8 = vld [vmem:[#allocation2 + $0x2c0] sm:$0xff]  ;;  %v129_v10 = vld [vmem:[#allocation2 + $0x2b8] sm:$0xff] }
  0x26   :  { %351 = vmatpush1.msra.mxu1 %v150_v47  ;;  %275 = vmatprep.subr.mxu0 %v52_v48  ;;  %v226_v9 = vld [vmem:[#allocation2 + $0x5c0] sm:$0xff]  ;;  %v225_v11 = vld [vmem:[#allocation2 + $0x5b8] sm:$0xff]  ;;  %v127_v12 = vld [vmem:[#allocation2 + $0x2a8] sm:$0xff] }
  0x27   :  { %352 = vmatprep.subr.mxu1 %v148_v49  ;;  %276 = vmatpush1.msra.mxu0 %v51_v50  ;;  %v223_v13 = vld [vmem:[#allocation2 + $0x5a8] sm:$0xff]  ;;  %v126_v14 = vld [vmem:[#allocation2 + $0x2a0] sm:$0xff]  ;;  %v124_v16 = vld [vmem:[#allocation2 + $0x290] sm:$0xff] }
  0x28   :  { %353 = vmatpush1.msra.mxu1 %v147_v51  ;;  %277 = vmatprep.subr.mxu0 %v49_v52  ;;  %v222_v15 = vld [vmem:[#allocation2 + $0x5a0] sm:$0xff]  ;;  %v220_v17 = vld [vmem:[#allocation2 + $0x590] sm:$0xff]  ;;  %v123_v18 = vld [vmem:[#allocation2 + $0x288] sm:$0xff] }
  0x29   :  { %354 = vmatprep.subr.mxu1 %v145_v53  ;;  %278 = vmatpush1.msra.mxu0 %v48_v54  ;;  %v219_v19 = vld [vmem:[#allocation2 + $0x588] sm:$0xff]  ;;  %v121_v20 = vld [vmem:[#allocation2 + $0x278] sm:$0xff]  ;;  %v120_v22 = vld [vmem:[#allocation2 + $0x270] sm:$0xff] }
  0x2a   :  { %355 = vmatpush1.msra.mxu1 %v144_v55  ;;  %279 = vmatprep.subr.mxu0 %v46_v56  ;;  %v217_v21 = vld [vmem:[#allocation2 + $0x578] sm:$0xff]  ;;  %v216_v23 = vld [vmem:[#allocation2 + $0x570] sm:$0xff]  ;;  %v118_v24 = vld [vmem:[#allocation2 + $0x260] sm:$0xff] }
  0x2b   :  { %356 = vmatprep.subr.mxu1 %v142_v57  ;;  %280 = vmatpush1.msra.mxu0 %v45_v58  ;;  %v214_v25 = vld [vmem:[#allocation2 + $0x560] sm:$0xff]  ;;  %v117_v26 = vld [vmem:[#allocation2 + $0x258] sm:$0xff]  ;;  %v115_v28 = vld [vmem:[#allocation2 + $0x248] sm:$0xff] }
  0x2c   :  { %357 = vmatpush1.msra.mxu1 %v141_v59  ;;  %281 = vmatprep.subr.mxu0 %v43_v60  ;;  %v213_v27 = vld [vmem:[#allocation2 + $0x558] sm:$0xff]  ;;  %v211_v29 = vld [vmem:[#allocation2 + $0x548] sm:$0xff]  ;;  %v114_v30 = vld [vmem:[#allocation2 + $0x240] sm:$0xff] }
  0x2d   :  { %358 = vmatprep.subr.mxu1 %v139_v61  ;;  %282 = vmatpush1.msra.mxu0 %v42_v62  ;;  %v210_v31 = vld [vmem:[#allocation2 + $0x540] sm:$0xff]  ;;  %v112_v32 = vld [vmem:[#allocation2 + $0x230] sm:$0xff]  ;;  %v111_v34 = vld [vmem:[#allocation2 + $0x228] sm:$0xff] }
  0x2e   :  { %359 = vmatpush1.msra.mxu1 %v138_v63  ;;  %283 = vmatprep.subr.mxu0 %v136_v0  ;;  %v208_v33 = vld [vmem:[#allocation2 + $0x530] sm:$0xff]  ;;  %v207_v35 = vld [vmem:[#allocation2 + $0x528] sm:$0xff]  ;;  %v109_v36 = vld [vmem:[#allocation2 + $0x218] sm:$0xff] }
  0x2f   :  { %360 = vmatprep.subr.mxu1 %v232_v1  ;;  %284 = vmatpush2.msra.mxu0 %v135_v2  ;;  %v205_v37 = vld [vmem:[#allocation2 + $0x518] sm:$0xff]  ;;  %v108_v38 = vld [vmem:[#allocation2 + $0x210] sm:$0xff]  ;;  %v106_v40 = vld [vmem:[#allocation2 + $0x200] sm:$0xff] }
  0x30   :  { %361 = vmatpush2.msra.mxu1 %v231_v3  ;;  %285 = vmatprep.subr.mxu0 %v133_v4  ;;  %v204_v39 = vld [vmem:[#allocation2 + $0x510] sm:$0xff]  ;;  %v202_v41 = vld [vmem:[#allocation2 + $0x500] sm:$0xff]  ;;  %v105_v42 = vld [vmem:[#allocation2 + $0x1f8] sm:$0xff] }
  0x31   :  { %362 = vmatprep.subr.mxu1 %v229_v5  ;;  %286 = vmatpush2.msra.mxu0 %v132_v6  ;;  %v201_v43 = vld [vmem:[#allocation2 + $0x4f8] sm:$0xff]  ;;  %v103_v44 = vld [vmem:[#allocation2 + $0x1e8] sm:$0xff]  ;;  %v102_v46 = vld [vmem:[#allocation2 + $0x1e0] sm:$0xff] }
  0x32   :  { %363 = vmatpush2.msra.mxu1 %v228_v7  ;;  %287 = vmatprep.subr.mxu0 %v130_v8  ;;  %v199_v45 = vld [vmem:[#allocation2 + $0x4e8] sm:$0xff]  ;;  %v198_v47 = vld [vmem:[#allocation2 + $0x4e0] sm:$0xff]  ;;  %v100_v48 = vld [vmem:[#allocation2 + $0x1d0] sm:$0xff] }
  0x33   :  { %364 = vmatprep.subr.mxu1 %v226_v9  ;;  %288 = vmatpush2.msra.mxu0 %v129_v10  ;;  %v196_v49 = vld [vmem:[#allocation2 + $0x4d0] sm:$0xff]  ;;  %v99_v50 = vld [vmem:[#allocation2 + $0x1c8] sm:$0xff]  ;;  %v97_v52 = vld [vmem:[#allocation2 + $0x1b8] sm:$0xff] }
  0x34   :  { %365 = vmatpush2.msra.mxu1 %v225_v11  ;;  %289 = vmatprep.subr.mxu0 %v127_v12  ;;  %v195_v51 = vld [vmem:[#allocation2 + $0x4c8] sm:$0xff]  ;;  %v193_v53 = vld [vmem:[#allocation2 + $0x4b8] sm:$0xff]  ;;  %v96_v54 = vld [vmem:[#allocation2 + $0x1b0] sm:$0xff] }
  0x35   :  { %366 = vmatprep.subr.mxu1 %v223_v13  ;;  %290 = vmatpush2.msra.mxu0 %v126_v14  ;;  %v192_v55 = vld [vmem:[#allocation2 + $0x4b0] sm:$0xff]  ;;  %v94_v56 = vld [vmem:[#allocation2 + $0x1a0] sm:$0xff]  ;;  %v93_v58 = vld [vmem:[#allocation2 + $0x198] sm:$0xff] }
  0x36   :  { %367 = vmatpush2.msra.mxu1 %v222_v15  ;;  %291 = vmatprep.subr.mxu0 %v124_v16  ;;  %v190_v57 = vld [vmem:[#allocation2 + $0x4a0] sm:$0xff]  ;;  %v189_v59 = vld [vmem:[#allocation2 + $0x498] sm:$0xff]  ;;  %v91_v60 = vld [vmem:[#allocation2 + $0x188] sm:$0xff] }
  0x37   :  { %368 = vmatprep.subr.mxu1 %v220_v17  ;;  %292 = vmatpush2.msra.mxu0 %v123_v18  ;;  %v187_v61 = vld [vmem:[#allocation2 + $0x488] sm:$0xff]  ;;  %v90_v62 = vld [vmem:[#allocation2 + $0x180] sm:$0xff]  ;;  %v2971_v1 = vld [vmem:[%s3489_s0 + $0x18] sm:$0xff] }
  0x38   :  { %369 = vmatpush2.msra.mxu1 %v219_v19  ;;  %293 = vmatprep.subr.mxu0 %v121_v20  ;;  %v2966_v63 = vld [vmem:[%s3489_s0 + $0x8] sm:$0xff]  ;;  %v186_v0 = vld [vmem:[#allocation2 + $0x480] sm:$0xff]  ;;  %v2981_v3 = vld [vmem:[%s3489_s0 + $0x10] sm:$0xff] }
  0x39   :  { %370 = vmatprep.subr.mxu1 %v217_v21  ;;  %294 = vmatpush2.msra.mxu0 %v120_v22  ;;  %v2976_v2 = vld [vmem:[%s3489_s0] sm:$0xff]  ;;  %v2987_v4 = vld [vmem:[%s3489_s0 + $0x28] sm:$0xff]  ;;  %v2992_v5 = vld [vmem:[%s3489_s0 + $0x38] sm:$0xff] }
  0x3a   :  { %371 = vmatpush2.msra.mxu1 %v216_v23  ;;  %295 = vmatprep.subr.mxu0 %v118_v24  ;;  %v137_v6 = vld [vmem:[#allocation2 + $0x2f8] sm:$0xff]  ;;  %v3002_v10 = vld [vmem:[%s3489_s0 + $0x20] sm:$0xff]  ;;  %v3007_v11 = vld [vmem:[%s3489_s0 + $0x30] sm:$0xff] }
  0x3b   :  { %372 = vmatprep.subr.mxu1 %v214_v25  ;;  %296 = vmatpush2.msra.mxu0 %v117_v26  ;;  %v233_v7 = vld [vmem:[#allocation2 + $0x5f8] sm:$0xff]  ;;  %v134_v12 = vld [vmem:[#allocation2 + $0x2e0] sm:$0xff]  ;;  %v131_v16 = vld [vmem:[#allocation2 + $0x2c8] sm:$0xff] }
  0x3c   :  { %373 = vmatpush2.msra.mxu1 %v213_v27  ;;  %297 = vmatprep.subr.mxu0 %v115_v28  ;;  %v89_v8 = vld [vmem:[#allocation2 + $0x178] sm:$0xff]  ;;  %v230_v13 = vld [vmem:[#allocation2 + $0x5e0] sm:$0xff]  ;;  %v227_v17 = vld [vmem:[#allocation2 + $0x5c8] sm:$0xff] }
  0x3d   :  { %374 = vmatprep.subr.mxu1 %v211_v29  ;;  %298 = vmatpush2.msra.mxu0 %v114_v30  ;;  %v185_v9 = vld [vmem:[#allocation2 + $0x478] sm:$0xff]  ;;  %v86_v14 = vld [vmem:[#allocation2 + $0x160] sm:$0xff]  ;;  %v83_v18 = vld [vmem:[#allocation2 + $0x148] sm:$0xff] }
  0x3e   :  { %375 = vmatpush2.msra.mxu1 %v210_v31  ;;  %299 = vmatprep.subr.mxu0 %v112_v32  ;;  %v182_v15 = vld [vmem:[#allocation2 + $0x460] sm:$0xff]  ;;  %v179_v19 = vld [vmem:[#allocation2 + $0x448] sm:$0xff]  ;;  %v128_v20 = vld [vmem:[#allocation2 + $0x2b0] sm:$0xff] }
  0x3f   :  { %376 = vmatprep.subr.mxu1 %v208_v33  ;;  %300 = vmatpush2.msra.mxu0 %v111_v34  ;;  %v224_v21 = vld [vmem:[#allocation2 + $0x5b0] sm:$0xff]  ;;  %v125_v24 = vld [vmem:[#allocation2 + $0x298] sm:$0xff]  ;;  %v122_v28 = vld [vmem:[#allocation2 + $0x280] sm:$0xff] }
  0x40   :  { %377 = vmatpush2.msra.mxu1 %v207_v35  ;;  %301 = vmatprep.subr.mxu0 %v109_v36  ;;  %v80_v22 = vld [vmem:[#allocation2 + $0x130] sm:$0xff]  ;;  %v221_v25 = vld [vmem:[#allocation2 + $0x598] sm:$0xff]  ;;  %v218_v29 = vld [vmem:[#allocation2 + $0x580] sm:$0xff] }
  0x41   :  { %378 = vmatprep.subr.mxu1 %v205_v37  ;;  %302 = vmatpush2.msra.mxu0 %v108_v38  ;;  %v176_v23 = vld [vmem:[#allocation2 + $0x430] sm:$0xff]  ;;  %v77_v26 = vld [vmem:[#allocation2 + $0x118] sm:$0xff]  ;;  %v74_v30 = vld [vmem:[#allocation2 + $0x100] sm:$0xff] }
  0x42   :  { %379 = vmatpush2.msra.mxu1 %v204_v39  ;;  %303 = vmatprep.subr.mxu0 %v106_v40  ;;  %v173_v27 = vld [vmem:[#allocation2 + $0x418] sm:$0xff]  ;;  %v170_v31 = vld [vmem:[#allocation2 + $0x400] sm:$0xff]  ;;  %v119_v32 = vld [vmem:[#allocation2 + $0x268] sm:$0xff] }
  0x43   :  { %380 = vmatprep.subr.mxu1 %v202_v41  ;;  %304 = vmatpush2.msra.mxu0 %v105_v42  ;;  %v215_v33 = vld [vmem:[#allocation2 + $0x568] sm:$0xff]  ;;  %v116_v36 = vld [vmem:[#allocation2 + $0x250] sm:$0xff]  ;;  %v113_v40 = vld [vmem:[#allocation2 + $0x238] sm:$0xff] }
  0x44   :  { %381 = vmatpush2.msra.mxu1 %v201_v43  ;;  %305 = vmatprep.subr.mxu0 %v103_v44  ;;  %v71_v34 = vld [vmem:[#allocation2 + $0xe8] sm:$0xff]  ;;  %v212_v37 = vld [vmem:[#allocation2 + $0x550] sm:$0xff]  ;;  %v209_v41 = vld [vmem:[#allocation2 + $0x538] sm:$0xff] }
  0x45   :  { %382 = vmatprep.subr.mxu1 %v199_v45  ;;  %306 = vmatpush2.msra.mxu0 %v102_v46  ;;  %v167_v35 = vld [vmem:[#allocation2 + $0x3e8] sm:$0xff]  ;;  %v68_v38 = vld [vmem:[#allocation2 + $0xd0] sm:$0xff]  ;;  %v65_v42 = vld [vmem:[#allocation2 + $0xb8] sm:$0xff] }
  0x46   :  { %383 = vmatpush2.msra.mxu1 %v198_v47  ;;  %307 = vmatprep.subr.mxu0 %v100_v48  ;;  %v164_v39 = vld [vmem:[#allocation2 + $0x3d0] sm:$0xff]  ;;  %v161_v43 = vld [vmem:[#allocation2 + $0x3b8] sm:$0xff]  ;;  %v110_v44 = vld [vmem:[#allocation2 + $0x220] sm:$0xff] }
  0x47   :  { %384 = vmatprep.subr.mxu1 %v196_v49  ;;  %308 = vmatpush2.msra.mxu0 %v99_v50  ;;  %v206_v45 = vld [vmem:[#allocation2 + $0x520] sm:$0xff]  ;;  %v107_v48 = vld [vmem:[#allocation2 + $0x208] sm:$0xff] }
  0x48   :  { %385 = vmatpush2.msra.mxu1 %v195_v51  ;;  %309 = vmatprep.subr.mxu0 %v97_v52  ;;  %v62_v46 = vld [vmem:[#allocation2 + $0xa0] sm:$0xff]  ;;  %v203_v49 = vld [vmem:[#allocation2 + $0x508] sm:$0xff]  ;;  %v104_v52 = vld [vmem:[#allocation2 + $0x1f0] sm:$0xff] }
  0x49   :  { %386 = vmatprep.subr.mxu1 %v193_v53  ;;  %310 = vmatpush2.msra.mxu0 %v96_v54  ;;  %v158_v47 = vld [vmem:[#allocation2 + $0x3a0] sm:$0xff]  ;;  %v59_v50 = vld [vmem:[#allocation2 + $0x88] sm:$0xff]  ;;  %v200_v53 = vld [vmem:[#allocation2 + $0x4f0] sm:$0xff] }
  0x4a   :  { %387 = vmatpush2.msra.mxu1 %v192_v55  ;;  %311 = vmatprep.subr.mxu0 %v94_v56  ;;  %v155_v51 = vld [vmem:[#allocation2 + $0x388] sm:$0xff]  ;;  %v56_v54 = vld [vmem:[#allocation2 + $0x70] sm:$0xff]  ;;  %v101_v56 = vld [vmem:[#allocation2 + $0x1d8] sm:$0xff] }
  0x4b   :  { %388 = vmatprep.subr.mxu1 %v190_v57  ;;  %312 = vmatpush2.msra.mxu0 %v93_v58  ;;  %v152_v55 = vld [vmem:[#allocation2 + $0x370] sm:$0xff]  ;;  %v197_v57 = vld [vmem:[#allocation2 + $0x4d8] sm:$0xff] }
  0x4c   :  { %389 = vmatpush2.msra.mxu1 %v189_v59  ;;  %313 = vmatprep.subr.mxu0 %v91_v60  ;;  %v53_v58 = vld [vmem:[#allocation2 + $0x58] sm:$0xff]  ;;  %v98_v60 = vld [vmem:[#allocation2 + $0x1c0] sm:$0xff] }
  0x4d   :  { %390 = vmatprep.subr.mxu1 %v187_v61  ;;  %314 = vmatpush2.msra.mxu0 %v90_v62  ;;  %v149_v59 = vld [vmem:[#allocation2 + $0x358] sm:$0xff]  ;;  %v50_v61 = vld [vmem:[#allocation2 + $0x40] sm:$0xff]  ;;  %v95_v62 = vld [vmem:[#allocation2 + $0x1a8] sm:$0xff] }
  0x4e   :  { %315 = vmatprep.mubr.f32.mxu0 %v2966_v63  ;;  %391 = vmatpush2.msra.mxu1 %v186_v0  ;;  %v47_v0 = vld [vmem:[#allocation2 + $0x28] sm:$0xff] }
  0x4f   :  { %392 = vmatprep.mubr.f32.mxu1 %v2971_v1  ;;  %316 = vmatmul.mubr.f32.vlgmr.msra.gmra.mxu0 %v2976_v2 }
  0x50   :  { %393 = vmatmul.mubr.f32.vlgmr.msra.gmra.mxu1 %v2981_v3  ;;  %321 = vmatprep.mubr.f32.mxu0 %v2987_v4 }
  0x51   :  { %398 = vmatprep.mubr.f32.mxu1 %v2992_v5  ;;  %2672 = vmatprep.subr.mxu0 %v137_v6  ;;  %v194_v6 = vld [vmem:[#allocation2 + $0x4c0] sm:$0xff] }
  0x52   :  { %2710 = vmatprep.subr.mxu1 %v233_v7  ;;  %2673 = vmatpush3.msra.mxu0 %v89_v8  ;;  %v146_v7 = vld [vmem:[#allocation2 + $0x340] sm:$0xff]  ;;  %v92_v8 = vld [vmem:[#allocation2 + $0x190] sm:$0xff] }
  0x53   :  { %2711 = vmatpush3.msra.mxu1 %v185_v9  ;;  %322 = vmatmul.mubr.f32.gmra.mxu0 %v3002_v10  ;;  %v191_v9 = vld [vmem:[#allocation2 + $0x4a8] sm:$0xff] }
  0x54   :  { %399 = vmatmul.mubr.f32.gmra.mxu1 %v3007_v11  ;;  %2674 = vmatprep.subr.mxu0 %v134_v12  ;;  %v44_v12 = vld [vmem:[#allocation2 + $0x10] sm:$0xff] }
  0x55   :  { %2712 = vmatprep.subr.mxu1 %v230_v13  ;;  %2675 = vmatpush3.msra.mxu0 %v86_v14  ;;  %v143_v13 = vld [vmem:[#allocation2 + $0x328] sm:$0xff]  ;;  %v188_v14 = vld [vmem:[#allocation2 + $0x490] sm:$0xff] }
  0x56   :  { %2713 = vmatpush3.msra.mxu1 %v182_v15  ;;  %2676 = vmatprep.subr.mxu0 %v131_v16 }
  0x57   :  { %2714 = vmatprep.subr.mxu1 %v227_v17  ;;  %2677 = vmatpush3.msra.mxu0 %v83_v18 }
  0x58   :  { %2715 = vmatpush3.msra.mxu1 %v179_v19  ;;  %2678 = vmatprep.subr.mxu0 %v128_v20 }
  0x59   :  { %2716 = vmatprep.subr.mxu1 %v224_v21  ;;  %2679 = vmatpush3.msra.mxu0 %v80_v22 }
  0x5a   :  { %2717 = vmatpush3.msra.mxu1 %v176_v23  ;;  %2680 = vmatprep.subr.mxu0 %v125_v24 }
  0x5b   :  { %2718 = vmatprep.subr.mxu1 %v221_v25  ;;  %2681 = vmatpush3.msra.mxu0 %v77_v26 }
  0x5c   :  { %2719 = vmatpush3.msra.mxu1 %v173_v27  ;;  %2682 = vmatprep.subr.mxu0 %v122_v28 }
  0x5d   :  { %2720 = vmatprep.subr.mxu1 %v218_v29  ;;  %2683 = vmatpush3.msra.mxu0 %v74_v30 }
  0x5e   :  { %2721 = vmatpush3.msra.mxu1 %v170_v31  ;;  %2684 = vmatprep.subr.mxu0 %v119_v32 }
  0x5f   :  { %2722 = vmatprep.subr.mxu1 %v215_v33  ;;  %2685 = vmatpush3.msra.mxu0 %v71_v34 }
  0x60   :  { %2723 = vmatpush3.msra.mxu1 %v167_v35  ;;  %2686 = vmatprep.subr.mxu0 %v116_v36 }
  0x61   :  { %2724 = vmatprep.subr.mxu1 %v212_v37  ;;  %2687 = vmatpush3.msra.mxu0 %v68_v38 }
  0x62   :  { %2725 = vmatpush3.msra.mxu1 %v164_v39  ;;  %2688 = vmatprep.subr.mxu0 %v113_v40 }
  0x63   :  { %2726 = vmatprep.subr.mxu1 %v209_v41  ;;  %2689 = vmatpush3.msra.mxu0 %v65_v42 }
  0x64   :  { %2727 = vmatpush3.msra.mxu1 %v161_v43  ;;  %2690 = vmatprep.subr.mxu0 %v110_v44 }
  0x65   :  { %2728 = vmatprep.subr.mxu1 %v206_v45  ;;  %2691 = vmatpush3.msra.mxu0 %v62_v46 }
  0x66   :  { %2729 = vmatpush3.msra.mxu1 %v158_v47  ;;  %2692 = vmatprep.subr.mxu0 %v107_v48 }
  0x67   :  { %2730 = vmatprep.subr.mxu1 %v203_v49  ;;  %2693 = vmatpush3.msra.mxu0 %v59_v50 }
  0x68   :  { %2731 = vmatpush3.msra.mxu1 %v155_v51  ;;  %2694 = vmatprep.subr.mxu0 %v104_v52 }
  0x69   :  { %2732 = vmatprep.subr.mxu1 %v200_v53  ;;  %2695 = vmatpush3.msra.mxu0 %v56_v54 }
  0x6a   :  { %2733 = vmatpush3.msra.mxu1 %v152_v55  ;;  %2696 = vmatprep.subr.mxu0 %v101_v56 }
  0x6b   :  { %2734 = vmatprep.subr.mxu1 %v197_v57  ;;  %2697 = vmatpush3.msra.mxu0 %v53_v58 }
  0x6c   :  { %2735 = vmatpush3.msra.mxu1 %v149_v59  ;;  %2698 = vmatprep.subr.mxu0 %v98_v60 }
  0x6d   :  { %469 = vmatprep.mubr.f32.mxu0 %v2966_v63  ;;  %2699 = vmatpush3.msra.mxu0 %v50_v61  ;;  %v140_v63 = vld [vmem:[#allocation2 + $0x310] sm:$0xff] }
  0x6e   :  { %544 = vmatprep.mubr.f32.mxu1 %v2971_v1  ;;  %2700 = vmatprep.subr.mxu0 %v95_v62  ;;  %v2925_v1 = vmov 0.0  }
  0x6f   :  { %2701 = vmatpush3.msra.mxu0 %v47_v0  ;;  %2736 = vmatprep.subr.mxu1 %v194_v6 }
  0x70   :  { %2737 = vmatpush3.msra.mxu1 %v146_v7  ;;  %2702 = vmatprep.subr.mxu0 %v92_v8 }
  0x71   :  { %2738 = vmatprep.subr.mxu1 %v191_v9  ;;  %2703 = vmatpush3.msra.mxu0 %v44_v12 }
  0x72   :  { %2739 = vmatpush3.msra.mxu1 %v143_v13  ;;  %470 = vmatmul.mubr.f32.vlgmr.msra.gmra.mxu0 %v2976_v2  ;;  %v236_v2 = vlaneseq }
  0x73   :  { %2740 = vmatprep.subr.mxu1 %v188_v14  ;;  %474 = vmatprep.mubr.f32.mxu0 %v2987_v4 }
  0x74   :  { %2741 = vmatpush3.msra.mxu1 %v140_v63  ;;  %2780 = vmatprep.subr.mxu0 %v2925_v1 }
  0x75   :  { %545 = vmatmul.mubr.f32.vlgmr.msra.gmra.mxu1 %v2981_v3  ;;  %2785 = vmatprep.subr.mxu1 %v2925_v1  ;;  %v3025_v3 = vshrl.u32 %v236_v2, 7 }
  0x76   :  { %549 = vmatprep.mubr.f32.mxu1 %v2992_v5  ;;  %475 = vmatmul.mubr.f32.gmra.mxu0 %v3002_v10  ;;  %v234_v5 = vld [vmem:[%s3491_s2] sm:$0x7]  ;;  %s2927_s2 = smov 96  }
  0x77   :  { %2782 = vmatprep.mubr.msk.f32.mxu0 %vm2926_vm0, %v2925_v1  ;;  %v238_v4 = vsub.s32 0, %v3025_v3  ;;  %v242_v10 = vsub.s32 1, %v3025_v3  ;;  %v246_v32 = vsub.s32 2, %v3025_v3 }
  0x79   :  { %550 = vmatmul.mubr.f32.gmra.mxu1 %v3007_v11  ;;  %v239_v11 = vrot.slane %v234_v5, %v238_v4  ;;  %v243_v15 = vrot.slane %v234_v5, %v242_v10  ;;  %v247_v34 = vrot.slane %v234_v5, %v246_v32 }
  0x7a   :  { %2787 = vmatprep.mubr.msk.f32.mxu1 %vm2926_vm0, %v2925_v1 }
 0x10f   :  { %v317_v16 = vpop.f32.mrf.mxu0 }
 0x110   :  { %v394_v17 = vpop.f32.mrf.mxu1  ;;  %v318_v18 = vadd.f32 %v317_v16, %v239_v11 }
 0x111   :  { %v319_v19 = vpop.f32.mrf.mxu0 }
 0x112   :  { %v396_v20 = vpop.f32.mrf.mxu1  ;;  %v3036_v21 = vadd.f32 %v394_v17, %v318_v18  ;;  %v320_v22 = vadd.f32 %v319_v19, %v243_v15 }
 0x113   :  { %v323_v23 = vpop.f32.mrf.mxu0 }
 0x114   :  { %v400_v24 = vpop.f32.mrf.mxu1  ;;  %v3038_v25 = vadd.f32 %v396_v20, %v320_v22  ;;  %893 = vrot.lane.b32.xlu1 %v3036_v21, %s2927_s2  ;;  %v324_v28 = vadd.f32 %v323_v23, %v239_v11 }
 0x115   :  { %v325_v26 = vpop.f32.mrf.mxu0 }
 0x116   :  { %v326_v27 = vadd.f32 %v325_v26, %v243_v15  ;;  %2781 = vmatpush3.xpose.msk.msra.mxu0 %vm555_vm1, %v3038_v25  ;;  %v402_v29 = vpop.f32.mrf.mxu1  ;;  %v3053_v31 = vadd.f32 %v400_v24, %v324_v28 }
 0x117   :  { %2790 = vmatprep.subr.mxu0 %v2925_v1 }
 0x118   :  { %v3045_v30 = vadd.f32 %v402_v29, %v326_v27 }
 0x119   :  { %2783 = vmatmul.mubr.msk.f32.vlgmr.msra.gmra.mxu0 %vm555_vm1, %v3036_v21 }
 0x11a   :  { %2786 = vmatpush3.xpose.msk.msra.mxu1 %vm555_vm1, %v3045_v30  ;;  %973 = vrot.lane.b32.xlu1 %v3045_v30, %s2927_s2 }
 0x11b   :  { %2795 = vmatprep.subr.mxu1 %v2925_v1  ;;  %2792 = vmatprep.mubr.msk.f32.mxu0 %vm2926_vm0, %v2925_v1 }
 0x11d   :  { %2788 = vmatmul.mubr.msk.f32.vlgmr.msra.gmra.mxu1 %vm555_vm1, %v3053_v31 }
 0x11e   :  { %2797 = vmatprep.mubr.msk.f32.mxu1 %vm2926_vm0, %v2925_v1 }
 0x132   :  { %v2704_v33 = vpop.f32.mrf.mxu0 }
 0x134   :  { %v2705_v35 = vpop.f32.mrf.mxu0 }
 0x135   :  { %v2742_v36 = vpop.f32.mrf.mxu1  ;;  %v2706_v37 = vadd.f32 %v2705_v35, %v2704_v33 }
 0x136   :  { %v2707_v38 = vpop.f32.mrf.mxu0 }
 0x137   :  { %v2743_v39 = vpop.f32.mrf.mxu1  ;;  %v472_v40 = vadd.f32 %v2706_v37, %v247_v34 }
 0x138   :  { %v2744_v41 = vadd.f32 %v2743_v39, %v2742_v36  ;;  %v2708_v42 = vpop.f32.mrf.mxu0 }
 0x139   :  { %v2745_v43 = vpop.f32.mrf.mxu1  ;;  %v2709_v44 = vadd.f32 %v2708_v42, %v2707_v38  ;;  %v1240_v42 = vld [vmem:[%s3492_s3 + $0xf8] sm:$0xff] }
 0x13a   :  { %v3065_v45 = vadd.f32 %v2744_v41, %v472_v40 }
 0x13b   :  { %v2746_v46 = vpop.f32.mrf.mxu1  ;;  %v477_v47 = vadd.f32 %v2709_v44, %v247_v34 }
 0x13c   :  { %v2747_v48 = vadd.f32 %v2746_v46, %v2745_v43  ;;  %2791 = vmatpush3.msra.mxu0 %v3065_v45  ;;  %v1238_v46 = vld [vmem:[%s3492_s3 + $0xe8] sm:$0xff] }
 0x13d   :  { %2800 = vmatprep.subr.mxu0 %v2925_v1 }
 0x13e   :  { %v3069_v49 = vadd.f32 %v2747_v48, %v477_v47 }
 0x140   :  { %2796 = vmatpush3.msra.mxu1 %v3069_v49 }
 0x141   :  { %2805 = vmatprep.subr.mxu1 %v2925_v1 }
 0x186   :  { %v894_v8 = vpop.permute.xlu1 %893 }
 0x18c   :  { %v974_v9 = vpop.permute.xlu1 %973 }
 0x1d9   :  { %v628_v50 = vpop.f32.mrf.mxu0 }
 0x1da   :  { %v709_v51 = vsel %vm708_vm2, %v628_v50, -inf }
 0x1db   :  { %710 = vmax.xlane.f32.xlu0 %v709_v51  ;;  %v2784_v52 = vpop.f32.mrf.mxu0  ;;  %v1237_v51 = vld [vmem:[%s3492_s3 + $0xe0] sm:$0xff] }
 0x1dc   :  { %v1234_v52 = vld [vmem:[%s3492_s3 + $0xc8] sm:$0xff] }
 0x1dd   :  { %v704_v53 = vpop.f32.mrf.mxu1 }
 0x1de   :  { %v712_v54 = vsel %vm708_vm2, %v704_v53, -inf }
 0x1df   :  { %v2789_v55 = vpop.f32.mrf.mxu1  ;;  %713 = vmax.xlane.f32.xlu0 %v712_v54 }
 0x1e0   :  { %v1230_v55 = vld [vmem:[%s3492_s3 + $0xa8] sm:$0xff] }
 0x1f5   :  { %895 = vrot.lane.b32.xlu0 %v3038_v25, %s2927_s2 }
 0x264   :  { %v711_v56 = vpop.xlane.xlu0 %710 }
 0x265   :  { %v715_v57 = vsub.f32 %v628_v50, %v711_v56 }
 0x267   :  { %v717_v58 = vmul.f32 1.442695, %v715_v57  ;;  %v1239_v57 = vld [vmem:[%s3492_s3 + $0xf0] sm:$0xff] }
 0x268   :  { %v714_v59 = vpop.xlane.xlu0 %713 }
 0x269   :  { %2868 = vpow2.f32 %v717_v58  ;;  %v716_v60 = vsub.f32 %v704_v53, %v714_v59  ;;  %v1233_v53 = vld [vmem:[%s3492_s3 + $0xc0] sm:$0xff]  ;;  %v1236_v59 = vld [vmem:[%s3492_s3 + $0xd8] sm:$0xff] }
 0x26a   :  { %v1229_v58 = vld [vmem:[%s3492_s3 + $0xa0] sm:$0xff] }
 0x26b   :  { %v719_v61 = vmul.f32 1.442695, %v716_v60  ;;  %v1226_v60 = vld [vmem:[%s3492_s3 + $0x88] sm:$0xff] }
 0x26c   :  { %v896_v2 = vpop.permute.xlu0 %895 }
 0x26d   :  { %2870 = vpow2.f32 %v719_v61  ;;  %v1235_v61 = vld [vmem:[%s3492_s3 + $0xd0] sm:$0xff] }
 0x276   :  { %v2869_v62 = vpop.eup %2868 }
 0x277   :  { %v721_v0 = vsel %vm708_vm2, %v2869_v62, 0.0 }
 0x278   :  { %722 = vadd.xlane.f32.xlu1 %v721_v0  ;;  %v1232_v0 = vld [vmem:[%s3492_s3 + $0xb8] sm:$0xff] }
 0x27a   :  { %v2871_v6 = vpop.eup %2870 }
 0x27b   :  { %v724_v7 = vsel %vm708_vm2, %v2871_v6, 0.0 }
 0x27c   :  { %725 = vadd.xlane.f32.xlu1 %v724_v7  ;;  %v1228_v7 = vld [vmem:[%s3492_s3 + $0x98] sm:$0xff] }
 0x28d   :  { %971 = vrot.lane.b32.xlu1 %v3053_v31, %s2927_s2 }
 0x301   :  { %v723_v12 = vpop.xlane.xlu1 %722 }
 0x302   :  { %2872 = vrcp.f32 %v723_v12  ;;  %v892_v12 = vld [vmem:[%s3492_s3 + $0x78] sm:$0xff] }
 0x305   :  { %v726_v13 = vpop.xlane.xlu1 %725 }
 0x306   :  { %2874 = vrcp.f32 %v726_v13  ;;  %v889_v13 = vld [vmem:[%s3492_s3 + $0x60] sm:$0xff] }
 0x309   :  { %v972_v15 = vpop.permute.xlu1 %971 }
 0x30f   :  { %v2873_v14 = vpop.eup %2872 }
 0x310   :  { %v729_v63 = vmul.f32 %v2873_v14, %v2869_v62  ;;  %v1225_v62 = vld [vmem:[%s3492_s3 + $0x80] sm:$0xff]  ;;  %v891_v14 = vld [vmem:[%s3492_s3 + $0x70] sm:$0xff] }
 0x312   :  { %2793 = vmatmul.mubr.msk.f32.vlgmr.msra.gmra.mxu0 %vm708_vm2, %v729_v63 }
 0x313   :  { %v2875_v5 = vpop.eup %2874  ;;  %2801 = vmatpush3.xpose.msk.msra.mxu0 %vm555_vm1, %v896_v2  ;;  %2802 = vmatprep.mubr.msk.f32.mxu0 %vm2926_vm0, %v2925_v1  ;;  %v886_v2 = vld [vmem:[%s3492_s3 + $0x48] sm:$0xff] }
 0x314   :  { %v730_v11 = vmul.f32 %v2875_v5, %v2871_v6  ;;  %2810 = vmatprep.subr.mxu0 %v2925_v1  ;;  %v1231_v6 = vld [vmem:[%s3492_s3 + $0xb0] sm:$0xff]  ;;  %v888_v5 = vld [vmem:[%s3492_s3 + $0x58] sm:$0xff] }
 0x316   :  { %2798 = vmatmul.mubr.msk.f32.vlgmr.msra.gmra.mxu1 %vm708_vm2, %v730_v11  ;;  %2803 = vmatmul.mubr.msk.f32.vlgmr.msra.gmra.mxu0 %vm555_vm1, %v894_v8  ;;  %v1227_v8 = vld [vmem:[%s3492_s3 + $0x90] sm:$0xff]  ;;  %v885_v11 = vld [vmem:[%s3492_s3 + $0x40] sm:$0xff] }
 0x317   :  { %2806 = vmatpush3.xpose.msk.msra.mxu1 %vm555_vm1, %v974_v9  ;;  %2807 = vmatprep.mubr.msk.f32.mxu1 %vm2926_vm0, %v2925_v1  ;;  %v890_v9 = vld [vmem:[%s3492_s3 + $0x68] sm:$0xff] }
 0x318   :  { %2815 = vmatprep.subr.mxu1 %v2925_v1  ;;  %2812 = vmatprep.mubr.msk.f32.mxu0 %vm2926_vm0, %v2925_v1 }
 0x31a   :  { %2808 = vmatmul.mubr.msk.f32.vlgmr.msra.gmra.mxu1 %vm555_vm1, %v972_v15  ;;  %v887_v15 = vld [vmem:[%s3492_s3 + $0x50] sm:$0xff] }
 0x31b   :  { %2817 = vmatprep.mubr.msk.f32.mxu1 %vm2926_vm0, %v2925_v1 }
 0x3d2   :  { %v3097_v16 = vpop.f32.mrf.mxu0 }
 0x3d4   :  { %v2794_v17 = vpop.f32.mrf.mxu0 }
 0x3d6   :  { %v3099_v18 = vpop.f32.mrf.mxu1  ;;  %v967_v19 = vpop.f32.mrf.mxu0 }
 0x3d7   :  { %v1049_v20 = vsel %vm708_vm2, %v967_v19, -inf }
 0x3d8   :  { %v2799_v22 = vpop.f32.mrf.mxu1  ;;  %1050 = vmax.xlane.f32.xlu0 %v1049_v20  ;;  %v2804_v23 = vpop.f32.mrf.mxu0  ;;  %v884_v20 = vld [vmem:[%s3492_s3 + $0x38] sm:$0xff] }
 0x3d9   :  { %v881_v23 = vld [vmem:[%s3492_s3 + $0x20] sm:$0xff] }
 0x3da   :  { %v1045_v24 = vpop.f32.mrf.mxu1 }
 0x3db   :  { %v1052_v26 = vsel %vm708_vm2, %v1045_v24, -inf }
 0x3dc   :  { %1053 = vmax.xlane.f32.xlu1 %v1052_v26  ;;  %v2809_v27 = vpop.f32.mrf.mxu1 }
 0x3dd   :  { %v878_v27 = vld [vmem:[%s3492_s3 + $0x8] sm:$0xff] }
 0x3ed   :  { %1149 = vrot.lane.b32.xlu1 %v3069_v49, %s2927_s2 }
 0x3f1   :  { %1563 = vrot.lane.b32.xlu1 %v3038_v25, %s2928_s16 }
 0x3f5   :  { %1561 = vrot.lane.b32.xlu1 %v3036_v21, %s2928_s16 }
 0x3f9   :  { %1639 = vrot.lane.b32.xlu1 %v3053_v31, %s2928_s16 }
 0x461   :  { %v1051_v28 = vpop.xlane.xlu0 %1050 }
 0x462   :  { %v1055_v29 = vsub.f32 %v967_v19, %v1051_v28  ;;  %v882_v19 = vld [vmem:[%s3492_s3 + $0x28] sm:$0xff]  ;;  %v880_v28 = vld [vmem:[%s3492_s3 + $0x18] sm:$0xff] }
 0x464   :  { %v1057_v33 = vmul.f32 1.442695, %v1055_v29  ;;  %v877_v29 = vld [vmem:[%s3492_s3] sm:$0xff] }
 0x465   :  { %v1054_v34 = vpop.xlane.xlu1 %1053 }
 0x466   :  { %2876 = vpow2.f32 %v1057_v33  ;;  %v1056_v35 = vsub.f32 %v1045_v24, %v1054_v34  ;;  %v883_v24 = vld [vmem:[%s3492_s3 + $0x30] sm:$0xff] }
 0x467   :  { %v879_v33 = vld [vmem:[%s3492_s3 + $0x10] sm:$0xff] }
 0x468   :  { %v1059_v36 = vmul.f32 1.442695, %v1056_v35 }
 0x469   :  { %v1150_v37 = vpop.permute.xlu1 %1149 }
 0x46a   :  { %2878 = vpow2.f32 %v1059_v36  ;;  %2816 = vmatpush3.msra.mxu1 %v1150_v37 }
 0x46b   :  { %1348 = vmatprep.subr.mxu1 %v1240_v42 }
 0x46d   :  { %v1564_v34 = vpop.permute.xlu1 %1563 }
 0x471   :  { %v1562_v36 = vpop.permute.xlu1 %1561 }
 0x473   :  { %v2877_v38 = vpop.eup %2876 }
 0x474   :  { %v1061_v39 = vsel %vm708_vm2, %v2877_v38, 0.0 }
 0x475   :  { %1062 = vadd.xlane.f32.xlu0 %v1061_v39 }
 0x477   :  { %v2879_v40 = vpop.eup %2878 }
 0x478   :  { %v1064_v41 = vsel %vm708_vm2, %v2879_v40, 0.0 }
 0x479   :  { %1065 = vadd.xlane.f32.xlu0 %v1064_v41 }
 0x48f   :  { %1072 = vrot.lane.b32.xlu0 %v3065_v45, %s2927_s2 }
 0x493   :  { %1641 = vrot.lane.b32.xlu0 %v3045_v30, %s2928_s16 }
 0x4fe   :  { %v1063_v43 = vpop.xlane.xlu0 %1062 }
 0x4ff   :  { %2880 = vrcp.f32 %v1063_v43 }
 0x502   :  { %v1066_v44 = vpop.xlane.xlu0 %1065 }
 0x503   :  { %2882 = vrcp.f32 %v1066_v44 }
 0x506   :  { %v1073_v47 = vpop.permute.xlu0 %1072 }
 0x507   :  { %2811 = vmatpush3.msra.mxu0 %v1073_v47 }
 0x508   :  { %1271 = vmatprep.subr.mxu0 %v1238_v46 }
 0x50a   :  { %v1642_v35 = vpop.permute.xlu0 %1641 }
 0x50c   :  { %v2881_v48 = vpop.eup %2880 }
 0x50d   :  { %v1069_v50 = vmul.f32 %v2881_v48, %v2877_v38 }
 0x50f   :  { %2813 = vmatmul.mubr.msk.f32.vlgmr.msra.gmra.mxu0 %vm708_vm2, %v1069_v50 }
 0x510   :  { %v2883_v54 = vpop.eup %2882  ;;  %1272 = vmatpush1.msra.mxu0 %v1237_v51  ;;  %1311 = vmatprep.mubr.f32.mxu0 %v2925_v1 }
 0x511   :  { %v1070_v56 = vmul.f32 %v2883_v54, %v2879_v40  ;;  %1273 = vmatprep.subr.mxu0 %v1234_v52 }
 0x512   :  { %1274 = vmatpush1.msra.mxu0 %v1233_v53 }
 0x513   :  { %2818 = vmatmul.mubr.msk.f32.vlgmr.msra.gmra.mxu1 %vm708_vm2, %v1070_v56  ;;  %1275 = vmatprep.subr.mxu0 %v1230_v55 }
 0x514   :  { %1349 = vmatpush1.msra.mxu1 %v1239_v57  ;;  %1276 = vmatpush1.msra.mxu0 %v1229_v58 }
 0x515   :  { %1350 = vmatprep.subr.mxu1 %v1236_v59  ;;  %1277 = vmatprep.subr.mxu0 %v1226_v60 }
 0x516   :  { %1351 = vmatpush1.msra.mxu1 %v1235_v61  ;;  %1278 = vmatpush1.msra.mxu0 %v1225_v62 }
 0x517   :  { %1352 = vmatprep.subr.mxu1 %v1232_v0  ;;  %1388 = vmatprep.mubr.f32.mxu1 %v2925_v1 }
 0x518   :  { %1353 = vmatpush1.msra.mxu1 %v1231_v6  ;;  %1431 = vmatprep.subr.mxu0 %v890_v9 }
 0x519   :  { %1354 = vmatprep.subr.mxu1 %v1228_v7 }
 0x51a   :  { %1355 = vmatpush1.msra.mxu1 %v1227_v8 }
 0x51b   :  { %1508 = vmatprep.subr.mxu1 %v892_v12 }
 0x5cf   :  { %v1144_v63 = vpop.f32.mrf.mxu0 }
 0x5d0   :  { %2644 = vmatmul.mubr.msk.f32.vlgmr.msra.gmra.mxu0 %vm555_vm1, %v1144_v63  ;;  %2646 = vmatmul.mubr.msk.f32.vlgmr.msra.gmra.mxu1 %vm555_vm1, %v1144_v63 }
 0x5d1   :  { %1432 = vmatpush1.msra.mxu0 %v889_v13  ;;  %1509 = vmatpush1.msra.mxu1 %v891_v14  ;;  %v2814_v17 = vpop.f32.mrf.mxu0 }
 0x5d2   :  { %1433 = vmatprep.subr.mxu0 %v886_v2  ;;  %1510 = vmatprep.subr.mxu1 %v888_v5 }
 0x5d3   :  { %1434 = vmatpush1.msra.mxu0 %v885_v11  ;;  %1511 = vmatpush1.msra.mxu1 %v887_v15  ;;  %v1221_v22 = vpop.f32.mrf.mxu1 }
 0x5d4   :  { %1317 = vmatprep.mubr.f32.mxu0 %v2925_v1  ;;  %1394 = vmatprep.mubr.f32.mxu1 %v2925_v1 }
 0x5d5   :  { %1435 = vmatprep.subr.mxu0 %v882_v19  ;;  %1512 = vmatprep.subr.mxu1 %v884_v20  ;;  %v2819_v26 = vpop.f32.mrf.mxu1 }
 0x5d6   :  { %2645 = vmatmul.mubr.msk.f32.gmra.mxu0 %vm555_vm1, %v1221_v22  ;;  %2647 = vmatmul.mubr.msk.f32.gmra.mxu1 %vm555_vm1, %v1221_v22  ;;  %v1904_v22 = vld [vmem:[%s3492_s3 + $0x168] sm:$0xff] }
 0x5d7   :  { %1436 = vmatpush1.msra.mxu0 %v881_v23  ;;  %1513 = vmatpush1.msra.mxu1 %v883_v24 }
 0x5d8   :  { %1437 = vmatprep.subr.mxu0 %v878_v27  ;;  %1514 = vmatprep.subr.mxu1 %v880_v28  ;;  %v1900_v27 = vld [vmem:[%s3492_s3 + $0x148] sm:$0xff]  ;;  %v1899_v28 = vld [vmem:[%s3492_s3 + $0x140] sm:$0xff] }
 0x5d9   :  { %1438 = vmatpush1.msra.mxu0 %v877_v29  ;;  %1515 = vmatpush1.msra.mxu1 %v879_v33  ;;  %v1896_v33 = vld [vmem:[%s3492_s3 + $0x128] sm:$0xff] }
 0x5da   :  { %1471 = vmatprep.mubr.f32.mxu0 %v2925_v1  ;;  %1548 = vmatprep.mubr.f32.mxu1 %v2925_v1 }
 0x5db   :  { %2820 = vmatprep.subr.mxu0 %v2925_v1  ;;  %2825 = vmatprep.subr.mxu1 %v2925_v1 }
 0x5dc   :  { %2648 = vmatmul.mubr.msk.f32.vlgmr.msra.gmra.mxu0 %vm555_vm1, %v3097_v16  ;;  %2650 = vmatmul.mubr.msk.f32.vlgmr.msra.gmra.mxu1 %vm555_vm1, %v3097_v16  ;;  %v1640_v16 = vpop.permute.xlu1 %1639 }
 0x5dd   :  { %2821 = vmatpush3.xpose.msk.msra.mxu0 %vm555_vm1, %v1564_v34  ;;  %2826 = vmatpush3.xpose.msk.msra.mxu1 %vm555_vm1, %v1642_v35  ;;  %v1905_v35 = vld [vmem:[%s3492_s3 + $0x170] sm:$0xff] }
 0x5de   :  { %1477 = vmatprep.mubr.f32.mxu0 %v2925_v1  ;;  %1554 = vmatprep.mubr.f32.mxu1 %v2925_v1 }
 0x5df   :  { %2835 = vmatprep.subr.mxu1 %v2925_v1  ;;  %2830 = vmatprep.subr.mxu0 %v2925_v1 }
 0x5e0   :  { %2649 = vmatmul.mubr.msk.f32.gmra.mxu0 %vm555_vm1, %v3099_v18  ;;  %2651 = vmatmul.mubr.msk.f32.gmra.mxu1 %vm555_vm1, %v3099_v18 }
 0x5e1   :  { %2822 = vmatprep.mubr.msk.f32.mxu0 %vm2926_vm0, %v2925_v1  ;;  %2827 = vmatprep.mubr.msk.f32.mxu1 %vm2926_vm0, %v2925_v1 }
 0x5e4   :  { %2823 = vmatmul.mubr.msk.f32.vlgmr.msra.gmra.mxu0 %vm555_vm1, %v1562_v36  ;;  %2828 = vmatmul.mubr.msk.f32.vlgmr.msra.gmra.mxu1 %vm555_vm1, %v1640_v16  ;;  %v1895_v36 = vld [vmem:[%s3492_s3 + $0x120] sm:$0xff]  ;;  %v1902_v16 = vld [vmem:[%s3492_s3 + $0x158] sm:$0xff] }
 0x5e5   :  { %2832 = vmatprep.mubr.msk.f32.mxu0 %vm2926_vm0, %v2925_v1  ;;  %2837 = vmatprep.mubr.msk.f32.mxu1 %vm2926_vm0, %v2925_v1 }
 0x690   :  { %v1313_v37 = vpop.f32.mrf.mxu0  ;;  %v1390_v38 = vpop.f32.mrf.mxu1 }
 0x692   :  { %v1315_v18 = vpop.f32.mrf.mxu0  ;;  %v1392_v39 = vpop.f32.mrf.mxu1 }
 0x696   :  { %v1319_v40 = vpop.f32.mrf.mxu0  ;;  %v1396_v41 = vpop.f32.mrf.mxu1 }
 0x698   :  { %v1321_v42 = vpop.f32.mrf.mxu0  ;;  %v1398_v43 = vpop.f32.mrf.mxu1 }
 0x69c   :  { %v1473_v44 = vpop.f32.mrf.mxu0  ;;  %v1550_v46 = vpop.f32.mrf.mxu1 }
 0x69d   :  { %v3251_v47 = vadd.f32 %v1473_v44, %v1313_v37  ;;  %v3253_v48 = vadd.f32 %v1550_v46, %v1390_v38  ;;  %v1892_v37 = vld [vmem:[%s3492_s3 + $0x108] sm:$0xff]  ;;  %v1901_v38 = vld [vmem:[%s3492_s3 + $0x150] sm:$0xff] }
 0x69e   :  { %v1475_v50 = vpop.f32.mrf.mxu0  ;;  %v1552_v51 = vpop.f32.mrf.mxu1 }
 0x69f   :  { %v3255_v52 = vadd.f32 %v1475_v50, %v1315_v18  ;;  %v3257_v53 = vadd.f32 %v1552_v51, %v1392_v39  ;;  %v1891_v18 = vld [vmem:[%s3492_s3 + $0x100] sm:$0xff]  ;;  %v1898_v39 = vld [vmem:[%s3492_s3 + $0x138] sm:$0xff] }
 0x6a0   :  { %v1479_v54 = vpop.f32.mrf.mxu0  ;;  %v1556_v55 = vpop.f32.mrf.mxu1 }
 0x6a1   :  { %v3259_v56 = vadd.f32 %v1479_v54, %v1319_v40  ;;  %v3261_v57 = vadd.f32 %v1556_v55, %v1396_v41  ;;  %v1897_v40 = vld [vmem:[%s3492_s3 + $0x130] sm:$0xff]  ;;  %v1894_v41 = vld [vmem:[%s3492_s3 + $0x118] sm:$0xff] }
 0x6a2   :  { %v1481_v58 = vpop.f32.mrf.mxu0  ;;  %v1558_v59 = vpop.f32.mrf.mxu1 }
 0x6a3   :  { %v3263_v60 = vadd.f32 %v1481_v58, %v1321_v42  ;;  %v3265_v61 = vadd.f32 %v1558_v59, %v1398_v43  ;;  %v1893_v42 = vld [vmem:[%s3492_s3 + $0x110] sm:$0xff] }
 0x6a4   :  { %v1635_v62 = vpop.f32.mrf.mxu0  ;;  %v1713_v0 = vpop.f32.mrf.mxu1 }
 0x6a5   :  { %v1720_v6 = vsel %vm708_vm2, %v1713_v0, -inf  ;;  %v1717_v7 = vsel %vm708_vm2, %v1635_v62, -inf }
 0x6a6   :  { %1721 = vmax.xlane.f32.xlu1 %v1720_v6  ;;  %v2829_v8 = vpop.f32.mrf.mxu1  ;;  %1718 = vmax.xlane.f32.xlu0 %v1717_v7  ;;  %v2824_v9 = vpop.f32.mrf.mxu0 }
 0x6b7   :  { %1815 = vrot.lane.b32.xlu1 %v3069_v49, %s2928_s16 }
 0x6bb   :  { %2077 = vrot.lane.b32.xlu1 %v3038_v25, %s2929_s26 }
 0x6bf   :  { %2075 = vrot.lane.b32.xlu1 %v3036_v21, %s2929_s26 }
 0x6c3   :  { %2153 = vrot.lane.b32.xlu1 %v3053_v31, %s2929_s26  ;;  %v1906_v31 = vld [vmem:[%s3492_s3 + $0x178] sm:$0xff] }
 0x72f   :  { %v1722_v12 = vpop.xlane.xlu1 %1721  ;;  %v1719_v13 = vpop.xlane.xlu0 %1718 }
 0x730   :  { %v1724_v14 = vsub.f32 %v1713_v0, %v1722_v12  ;;  %v1723_v63 = vsub.f32 %v1635_v62, %v1719_v13 }
 0x732   :  { %v1725_v2 = vmul.f32 1.442695, %v1723_v63  ;;  %v1727_v5 = vmul.f32 1.442695, %v1724_v14 }
 0x733   :  { %v1816_v11 = vpop.permute.xlu1 %1815 }
 0x734   :  { %2836 = vmatpush3.msra.mxu1 %v1816_v11  ;;  %2884 = vpow2.f32 %v1725_v2 }
 0x735   :  { %2886 = vpow2.f32 %v1727_v5  ;;  %2014 = vmatprep.subr.mxu1 %v1906_v31 }
 0x737   :  { %v2078_v43 = vpop.permute.xlu1 %2077 }
 0x73b   :  { %v2076_v50 = vpop.permute.xlu1 %2075 }
 0x73f   :  { %v2154_v58 = vpop.permute.xlu1 %2153 }
 0x741   :  { %v2885_v15 = vpop.eup %2884 }
 0x742   :  { %v1729_v17 = vsel %vm708_vm2, %v2885_v15, 0.0  ;;  %v2887_v25 = vpop.eup %2886 }
 0x743   :  { %1730 = vadd.xlane.f32.xlu0 %v1729_v17  ;;  %v1732_v21 = vsel %vm708_vm2, %v2887_v25, 0.0 }
 0x747   :  { %1733 = vadd.xlane.f32.xlu0 %v1732_v21 }
 0x75d   :  { %1739 = vrot.lane.b32.xlu0 %v3065_v45, %s2928_s16 }
 0x761   :  { %2155 = vrot.lane.b32.xlu0 %v3045_v30, %s2929_s26  ;;  %v1903_v30 = vld [vmem:[%s3492_s3 + $0x160] sm:$0xff] }
 0x7cc   :  { %v1731_v19 = vpop.xlane.xlu0 %1730 }
 0x7cd   :  { %2888 = vrcp.f32 %v1731_v19 }
 0x7d0   :  { %v1734_v20 = vpop.xlane.xlu0 %1733 }
 0x7d1   :  { %2890 = vrcp.f32 %v1734_v20 }
 0x7d4   :  { %v1740_v23 = vpop.permute.xlu0 %1739 }
 0x7d5   :  { %2831 = vmatpush3.msra.mxu0 %v1740_v23 }
 0x7d6   :  { %1937 = vmatprep.subr.mxu0 %v1904_v22 }
 0x7d8   :  { %v2156_v46 = vpop.permute.xlu0 %2155 }
 0x7da   :  { %v2889_v24 = vpop.eup %2888 }
 0x7db   :  { %v1737_v26 = vmul.f32 %v2889_v24, %v2885_v15 }
 0x7dd   :  { %2833 = vmatmul.mubr.msk.f32.vlgmr.msra.gmra.mxu0 %vm708_vm2, %v1737_v26 }
 0x7de   :  { %v2891_v29 = vpop.eup %2890  ;;  %1938 = vmatpush1.msra.mxu0 %v1903_v30  ;;  %1977 = vmatprep.mubr.f32.mxu0 %v2925_v1 }
 0x7df   :  { %v1738_v34 = vmul.f32 %v2891_v29, %v2887_v25  ;;  %1939 = vmatprep.subr.mxu0 %v1900_v27 }
 0x7e0   :  { %1940 = vmatpush1.msra.mxu0 %v1899_v28  ;;  %v2418_v28 = vld [vmem:[%s3492_s3 + $0x1e8] sm:$0xff] }
 0x7e1   :  { %2838 = vmatmul.mubr.msk.f32.vlgmr.msra.gmra.mxu1 %vm708_vm2, %v1738_v34  ;;  %1941 = vmatprep.subr.mxu0 %v1896_v33 }
 0x7e2   :  { %2015 = vmatpush1.msra.mxu1 %v1905_v35  ;;  %1942 = vmatpush1.msra.mxu0 %v1895_v36  ;;  %v2414_v35 = vld [vmem:[%s3492_s3 + $0x1c8] sm:$0xff]  ;;  %v2413_v36 = vld [vmem:[%s3492_s3 + $0x1c0] sm:$0xff] }
 0x7e3   :  { %2016 = vmatprep.subr.mxu1 %v1902_v16  ;;  %1943 = vmatprep.subr.mxu0 %v1892_v37  ;;  %v2410_v37 = vld [vmem:[%s3492_s3 + $0x1a8] sm:$0xff] }
 0x7e4   :  { %2017 = vmatpush1.msra.mxu1 %v1901_v38  ;;  %1944 = vmatpush1.msra.mxu0 %v1891_v18  ;;  %v2419_v18 = vld [vmem:[%s3492_s3 + $0x1f0] sm:$0xff] }
 0x7e5   :  { %2018 = vmatprep.subr.mxu1 %v1898_v39  ;;  %2054 = vmatprep.mubr.f32.mxu1 %v2925_v1  ;;  %v2409_v39 = vld [vmem:[%s3492_s3 + $0x1a0] sm:$0xff] }
 0x7e6   :  { %2019 = vmatpush1.msra.mxu1 %v1897_v40  ;;  %2840 = vmatprep.subr.mxu0 %v2925_v1  ;;  %v2416_v40 = vld [vmem:[%s3492_s3 + $0x1d8] sm:$0xff] }
 0x7e7   :  { %2020 = vmatprep.subr.mxu1 %v1894_v41  ;;  %v2406_v41 = vld [vmem:[%s3492_s3 + $0x188] sm:$0xff] }
 0x7e8   :  { %2021 = vmatpush1.msra.mxu1 %v1893_v42  ;;  %v2415_v42 = vld [vmem:[%s3492_s3 + $0x1d0] sm:$0xff] }
 0x7e9   :  { %2845 = vmatprep.subr.mxu1 %v2925_v1 }
 0x89d   :  { %v1811_v44 = vpop.f32.mrf.mxu0 }
 0x89e   :  { %2658 = vmatmul.mubr.msk.f32.vlgmr.msra.gmra.mxu0 %vm555_vm1, %v1811_v44  ;;  %2660 = vmatmul.mubr.msk.f32.vlgmr.msra.gmra.mxu1 %vm555_vm1, %v1811_v44  ;;  %v2411_v44 = vld [vmem:[%s3492_s3 + $0x1b0] sm:$0xff] }
 0x89f   :  { %2841 = vmatpush3.xpose.msk.msra.mxu0 %vm555_vm1, %v2078_v43  ;;  %2846 = vmatpush3.xpose.msk.msra.mxu1 %vm555_vm1, %v2156_v46  ;;  %v2834_v51 = vpop.f32.mrf.mxu0  ;;  %v2412_v43 = vld [vmem:[%s3492_s3 + $0x1b8] sm:$0xff] }
 0x8a0   :  { %1983 = vmatprep.mubr.f32.mxu0 %v2925_v1  ;;  %2060 = vmatprep.mubr.f32.mxu1 %v2925_v1  ;;  %v2408_v46 = vld [vmem:[%s3492_s3 + $0x198] sm:$0xff]  ;;  %v2407_v51 = vld [vmem:[%s3492_s3 + $0x190] sm:$0xff] }
 0x8a1   :  { %v1887_v54 = vpop.f32.mrf.mxu1  ;;  %2855 = vmatprep.subr.mxu1 %v2925_v1  ;;  %2850 = vmatprep.subr.mxu0 %v2925_v1 }
 0x8a2   :  { %2659 = vmatmul.mubr.msk.f32.gmra.mxu0 %vm555_vm1, %v1887_v54  ;;  %2661 = vmatmul.mubr.msk.f32.gmra.mxu1 %vm555_vm1, %v1887_v54 }
 0x8a3   :  { %v2839_v55 = vpop.f32.mrf.mxu1  ;;  %2842 = vmatprep.mubr.msk.f32.mxu0 %vm2926_vm0, %v2925_v1  ;;  %2847 = vmatprep.mubr.msk.f32.mxu1 %vm2926_vm0, %v2925_v1 }
 0x8a6   :  { %2843 = vmatmul.mubr.msk.f32.vlgmr.msra.gmra.mxu0 %vm555_vm1, %v2076_v50  ;;  %2848 = vmatmul.mubr.msk.f32.vlgmr.msra.gmra.mxu1 %vm555_vm1, %v2154_v58  ;;  %v2405_v50 = vld [vmem:[%s3492_s3 + $0x180] sm:$0xff] }
 0x8a7   :  { %2852 = vmatprep.mubr.msk.f32.mxu0 %vm2926_vm0, %v2925_v1  ;;  %2857 = vmatprep.mubr.msk.f32.mxu1 %vm2926_vm0, %v2925_v1 }
 0x95e   :  { %v1979_v59 = vpop.f32.mrf.mxu0  ;;  %v2056_v62 = vpop.f32.mrf.mxu1 }
 0x95f   :  { %v3358_v0 = vadd.f32 %v1979_v59, %v3251_v47  ;;  %v3361_v6 = vadd.f32 %v2056_v62, %v3253_v48  ;;  %v2589_v62 = vld [vmem:[%s3493_s4] sm:$0xf] }
 0x960   :  { %v1981_v7 = vpop.f32.mrf.mxu0  ;;  %v2058_v8 = vpop.f32.mrf.mxu1 }
 0x961   :  { %v3364_v9 = vadd.f32 %v1981_v7, %v3255_v52  ;;  %v3367_v12 = vadd.f32 %v2058_v8, %v3257_v53  ;;  %v2605_v7 = vsub.s32 3, %v3025_v3  ;;  %v2594_v8 = vrot.slane %v2589_v62, %v238_v4 }
 0x962   :  { %v1985_v13 = vpop.f32.mrf.mxu0  ;;  %v2062_v14 = vpop.f32.mrf.mxu1 }
 0x963   :  { %v3370_v63 = vadd.f32 %v1985_v13, %v3259_v56  ;;  %v3373_v2 = vadd.f32 %v2062_v14, %v3261_v57  ;;  %v2602_v13 = vrot.slane %v2589_v62, %v246_v32 }
 0x964   :  { %v1987_v47 = vpop.f32.mrf.mxu0  ;;  %v2064_v5 = vpop.f32.mrf.mxu1 }
 0x965   :  { %v3376_v48 = vadd.f32 %v1987_v47, %v3263_v60  ;;  %v3379_v11 = vadd.f32 %v2064_v5, %v3265_v61 }
 0x966   :  { %v2149_v52 = vpop.f32.mrf.mxu0  ;;  %v2227_v15 = vpop.f32.mrf.mxu1 }
 0x967   :  { %v2234_v53 = vsel %vm708_vm2, %v2227_v15, -inf  ;;  %v2231_v17 = vsel %vm708_vm2, %v2149_v52, -inf }
 0x968   :  { %2235 = vmax.xlane.f32.xlu1 %v2234_v53  ;;  %v2849_v56 = vpop.f32.mrf.mxu1  ;;  %2232 = vmax.xlane.f32.xlu0 %v2231_v17  ;;  %v2844_v25 = vpop.f32.mrf.mxu0 }
 0x979   :  { %2329 = vrot.lane.b32.xlu1 %v3069_v49, %s2929_s26  ;;  %v2420_v49 = vld [vmem:[%s3492_s3 + $0x1f8] sm:$0xff] }
 0x9f1   :  { %v2236_v57 = vpop.xlane.xlu1 %2235  ;;  %v2233_v21 = vpop.xlane.xlu0 %2232 }
 0x9f2   :  { %v2238_v60 = vsub.f32 %v2227_v15, %v2236_v57  ;;  %v2237_v31 = vsub.f32 %v2149_v52, %v2233_v21  ;;  %v2598_v52 = vrot.slane %v2589_v62, %v242_v10  ;;  %v2606_v15 = vrot.slane %v2589_v62, %v2605_v7 }
 0x9f4   :  { %v2239_v19 = vmul.f32 1.442695, %v2237_v31  ;;  %v2241_v61 = vmul.f32 1.442695, %v2238_v60 }
 0x9f5   :  { %v2330_v20 = vpop.permute.xlu1 %2329 }
 0x9f6   :  { %2856 = vmatpush3.msra.mxu1 %v2330_v20  ;;  %2892 = vpow2.f32 %v2239_v19 }
 0x9f7   :  { %2894 = vpow2.f32 %v2241_v61  ;;  %2528 = vmatprep.subr.mxu1 %v2420_v49 }
 0xa03   :  { %v2893_v22 = vpop.eup %2892 }
 0xa04   :  { %v2243_v23 = vsel %vm708_vm2, %v2893_v22, 0.0  ;;  %v2895_v24 = vpop.eup %2894 }
 0xa05   :  { %2244 = vadd.xlane.f32.xlu0 %v2243_v23  ;;  %v2246_v26 = vsel %vm708_vm2, %v2895_v24, 0.0 }
 0xa09   :  { %2247 = vadd.xlane.f32.xlu0 %v2246_v26 }
 0xa1f   :  { %2253 = vrot.lane.b32.xlu0 %v3065_v45, %s2929_s26  ;;  %v2417_v45 = vld [vmem:[%s3492_s3 + $0x1e0] sm:$0xff] }
 0xa8e   :  { %v2245_v30 = vpop.xlane.xlu0 %2244 }
 0xa8f   :  { %2896 = vrcp.f32 %v2245_v30 }
 0xa92   :  { %v2248_v27 = vpop.xlane.xlu0 %2247 }
 0xa93   :  { %2898 = vrcp.f32 %v2248_v27 }
 0xa96   :  { %v2254_v29 = vpop.permute.xlu0 %2253 }
 0xa97   :  { %2851 = vmatpush3.msra.mxu0 %v2254_v29 }
 0xa98   :  { %2451 = vmatprep.subr.mxu0 %v2418_v28 }
 0xa9c   :  { %v2897_v33 = vpop.eup %2896 }
 0xa9d   :  { %v2251_v34 = vmul.f32 %v2897_v33, %v2893_v22 }
 0xa9f   :  { %2853 = vmatmul.mubr.msk.f32.vlgmr.msra.gmra.mxu0 %vm708_vm2, %v2251_v34 }
 0xaa0   :  { %v2899_v16 = vpop.eup %2898  ;;  %2452 = vmatpush1.msra.mxu0 %v2417_v45  ;;  %2491 = vmatprep.mubr.f32.mxu0 %v2925_v1 }
 0xaa1   :  { %v2252_v38 = vmul.f32 %v2899_v16, %v2895_v24  ;;  %2453 = vmatprep.subr.mxu0 %v2414_v35 }
 0xaa2   :  { %2454 = vmatpush1.msra.mxu0 %v2413_v36 }
 0xaa3   :  { %2858 = vmatmul.mubr.msk.f32.vlgmr.msra.gmra.mxu1 %vm708_vm2, %v2252_v38  ;;  %2455 = vmatprep.subr.mxu0 %v2410_v37 }
 0xaa4   :  { %2529 = vmatpush1.msra.mxu1 %v2419_v18  ;;  %2456 = vmatpush1.msra.mxu0 %v2409_v39 }
 0xaa5   :  { %2530 = vmatprep.subr.mxu1 %v2416_v40  ;;  %2457 = vmatprep.subr.mxu0 %v2406_v41 }
 0xaa6   :  { %2531 = vmatpush1.msra.mxu1 %v2415_v42  ;;  %2568 = vmatprep.mubr.f32.mxu1 %v2925_v1 }
 0xaa7   :  { %2532 = vmatprep.subr.mxu1 %v2412_v43  ;;  %2458 = vmatpush1.msra.mxu0 %v2405_v50 }
 0xaa8   :  { %2533 = vmatpush1.msra.mxu1 %v2411_v44 }
 0xaa9   :  { %2534 = vmatprep.subr.mxu1 %v2408_v46 }
 0xaaa   :  { %2535 = vmatpush1.msra.mxu1 %v2407_v51 }
 0xb5f   :  { %v2325_v54 = vpop.f32.mrf.mxu0 }
 0xb60   :  { %2668 = vmatmul.mubr.msk.f32.vlgmr.msra.gmra.mxu0 %vm555_vm1, %v2325_v54  ;;  %2670 = vmatmul.mubr.msk.f32.vlgmr.msra.gmra.mxu1 %vm555_vm1, %v2325_v54 }
 0xb61   :  { %v2854_v55 = vpop.f32.mrf.mxu0  ;;  %2497 = vmatprep.mubr.f32.mxu0 %v2925_v1  ;;  %2574 = vmatprep.mubr.f32.mxu1 %v2925_v1 }
 0xb63   :  { %v2401_v58 = vpop.f32.mrf.mxu1 }
 0xb64   :  { %2669 = vmatmul.mubr.msk.f32.gmra.mxu0 %vm555_vm1, %v2401_v58  ;;  %2671 = vmatmul.mubr.msk.f32.gmra.mxu1 %vm555_vm1, %v2401_v58 }
 0xb65   :  { %v2859_v59 = vpop.f32.mrf.mxu1 }
 0xc20   :  { %v2493_v14 = vpop.f32.mrf.mxu0  ;;  %v2570_v1 = vpop.f32.mrf.mxu1 }
 0xc21   :  { %v2581_v47 = vadd.f32 %v2493_v14, %v3358_v0  ;;  %v2583_v5 = vadd.f32 %v2570_v1, %v3361_v6 }
 0xc22   :  { %v2495_v53 = vpop.f32.mrf.mxu0  ;;  %v2572_v17 = vpop.f32.mrf.mxu1 }
 0xc23   :  { %v2611_v56 = vadd.f32 %v2594_v8, %v2581_v47  ;;  %v2613_v25 = vadd.f32 %v2602_v13, %v2583_v5  ;;  %v2582_v57 = vadd.f32 %v2495_v53, %v3364_v9  ;;  %v2584_v4 = vadd.f32 %v2572_v17, %v3367_v12 }
 0xc24   :  { %v2499_v21 = vpop.f32.mrf.mxu0  ;;  %v2576_v32 = vpop.f32.mrf.mxu1 }
 0xc25   :  { %2619 = vst [vmem:[%s3494_s5] sm:$0xff] %v2611_v56  ;;  %2621 = vst [vmem:[%s3494_s5 + $0x10] sm:$0xff] %v2613_v25  ;;  %v2612_v3 = vadd.f32 %v2598_v52, %v2582_v57  ;;  %v2614_v10 = vadd.f32 %v2606_v15, %v2584_v4  ;;  %v2585_v0 = vadd.f32 %v2499_v21, %v3370_v63 }
 0xc26   :  { %v2587_v6 = vadd.f32 %v2576_v32, %v3373_v2  ;;  %v2501_v60 = vpop.f32.mrf.mxu0  ;;  %v2578_v9 = vpop.f32.mrf.mxu1 }
 0xc27   :  { %2620 = vst [vmem:[%s3494_s5 + $0x8] sm:$0xff] %v2612_v3  ;;  %2622 = vst [vmem:[%s3494_s5 + $0x18] sm:$0xff] %v2614_v10  ;;  %v2615_v12 = vadd.f32 %v2594_v8, %v2585_v0  ;;  %v2586_v19 = vadd.f32 %v2501_v60, %v3376_v48  ;;  %v2588_v61 = vadd.f32 %v2578_v9, %v3379_v11 }
 0xc28   :  { %v2617_v31 = vadd.f32 %v2602_v13, %v2587_v6 }
 0xc29   :  { %2623 = vst [vmem:[%s3494_s5 + $0x20] sm:$0xff] %v2615_v12  ;;  %v2616_v63 = vadd.f32 %v2598_v52, %v2586_v19  ;;  %v2618_v2 = vadd.f32 %v2606_v15, %v2588_v61 }
 0xc2a   :  { %2625 = vst [vmem:[%s3494_s5 + $0x30] sm:$0xff] %v2617_v31 }
 0xc2b   :  { %2624 = vst [vmem:[%s3494_s5 + $0x28] sm:$0xff] %v2616_v63  ;;  %2626 = vst [vmem:[%s3494_s5 + $0x38] sm:$0xff] %v2618_v2 }
 0xc2c   :  { %2631 = vsyncpa [#allocation3], 1 }

</bundles_post_ra>
